<compile_context>
chip_gen: v7x
topology: tpu7x:2x2x1
jax: 0.10.0
libtpu: 0.0.40
codegen_flags: <defaults>
</compile_context>

<pallas_src>
import jax
import jax.numpy as jnp
import numpy as np
from jax.experimental import pallas as pl
from jax.experimental.pallas import tpu as pltpu

LN_EPS = 1e-5          # nn.LayerNorm default eps
LEAKY_SLOPE = 0.01     # nn.LeakyReLU default negative_slope


def _feature_extractor_kernel(x_ref, gamma_ref, beta_ref,
                              wpT_ref, bp_ref,
                              wihT_r_ref, wihT_z_ref, wihT_n_ref,
                              whhT_r_ref, whhT_z_ref, whhT_n_ref,
                              gb_r_ref, gb_z_ref, gb_n_ref, bhh_n_ref,
                              out_ref,
                              gx_r_ref, gx_z_ref, gx_n_ref):
    """One-shot kernel: batched prologue over all T, then serial GRU loop."""
    T, B, F = x_ref.shape
    H = out_ref.shape[-1]

    # ---------- time-parallel prologue: LN -> Linear+LeakyReLU -> Wih proj ----
    x = x_ref[...].astype(jnp.float32).reshape(T * B, F)          # (T*B, F)
    mean = jnp.mean(x, axis=-1, keepdims=True)
    xc = x - mean
    var = jnp.mean(xc * xc, axis=-1, keepdims=True)               # biased var
    xn = xc * jax.lax.rsqrt(var + LN_EPS)
    xn = xn * gamma_ref[...] + beta_ref[...]                      # (T*B, F)

    p = jnp.dot(xn, wpT_ref[...], preferred_element_type=jnp.float32) + bp_ref[...]
    p = jnp.where(p >= 0, p, LEAKY_SLOPE * p)                     # (T*B, H)

    # gx_r/gx_z carry bih+bhh; gx_n carries only bih (bhh_n stays inside r*(...)).
    gx_r_ref[...] = (jnp.dot(p, wihT_r_ref[...], preferred_element_type=jnp.float32)
                     + gb_r_ref[...]).reshape(T, B, H)
    gx_z_ref[...] = (jnp.dot(p, wihT_z_ref[...], preferred_element_type=jnp.float32)
                     + gb_z_ref[...]).reshape(T, B, H)
    gx_n_ref[...] = (jnp.dot(p, wihT_n_ref[...], preferred_element_type=jnp.float32)
                     + gb_n_ref[...]).reshape(T, B, H)

    # ---------- serial GRU recurrence (3 small gh matmuls + gates per step) ---
    whhT_r = whhT_r_ref[...]        # loop-invariant, hoisted
    whhT_z = whhT_z_ref[...]
    whhT_n = whhT_n_ref[...]
    bhh_n = jnp.broadcast_to(bhh_n_ref[...], (B, H))   # hoisted broadcast

    def step(t, h):
        gh_r = jnp.dot(h, whhT_r, preferred_element_type=jnp.float32)   # (B, H)
        gh_z = jnp.dot(h, whhT_z, preferred_element_type=jnp.float32)
        gh_n = jnp.dot(h, whhT_n, preferred_element_type=jnp.float32)
        r = jax.nn.sigmoid(gx_r_ref[t] + gh_r)
        z = jax.nn.sigmoid(gx_z_ref[t] + gh_z)
        n = jnp.tanh(gx_n_ref[t] + r * (gh_n + bhh_n))
        return (1.0 - z) * n + z * h

    h0 = jnp.zeros((B, H), jnp.float32)                           # PyTorch h0 = 0
    h = jax.lax.fori_loop(0, T, step, h0, unroll=True)
    out_ref[...] = h.astype(out_ref.dtype)


def feature_extractor(x, params):
    """x: (T, B, F) float32.  Returns (B, H) float32 == output[-1] of the GRU."""
    T, B, F = x.shape
    H = params["wp"].shape[0]

    gamma = params["gamma"].reshape(1, F)
    beta = params["beta"].reshape(1, F)
    wpT = params["wp"].T                      # (F, H)  pre-transposed
    bp = params["bp"].reshape(1, H)

    wih, whh = params["wih"], params["whh"]   # (3H, H) each, rows = [r | z | n]
    bih, bhh = params["bih"], params["bhh"]
    wihT_r, wihT_z, wihT_n = wih[:H].T, wih[H:2 * H].T, wih[2 * H:].T   # (H, H)
    whhT_r, whhT_z, whhT_n = whh[:H].T, whh[H:2 * H].T, whh[2 * H:].T   # (H, H)
    gb_r = (bih[:H] + bhh[:H]).reshape(1, H)
    gb_z = (bih[H:2 * H] + bhh[H:2 * H]).reshape(1, H)
    gb_n = bih[2 * H:].reshape(1, H)
    bhh_n = bhh[2 * H:].reshape(1, H)

    vmem = lambda: pl.BlockSpec(memory_space=pltpu.MemorySpace.VMEM)

    return pl.pallas_call(
        _feature_extractor_kernel,
        out_shape=jax.ShapeDtypeStruct((B, H), jnp.float32),
        in_specs=[vmem() for _ in range(15)],     # whole arrays resident in VMEM
        out_specs=vmem(),
        scratch_shapes=[pltpu.VMEM((T, B, H), jnp.float32),   # gx_r
                        pltpu.VMEM((T, B, H), jnp.float32),   # gx_z
                        pltpu.VMEM((T, B, H), jnp.float32)],  # gx_n
    )(x, gamma, beta, wpT, bp,
      wihT_r, wihT_z, wihT_n, whhT_r, whhT_z, whhT_n,
      gb_r, gb_z, gb_n, bhh_n)


def _reference(x, params):
    """Pure-JAX reference mirroring the PyTorch forward."""
    gamma, beta = params["gamma"], params["beta"]
    mean = jnp.mean(x, axis=-1, keepdims=True)
    var = jnp.mean((x - mean) ** 2, axis=-1, keepdims=True)
    xn = (x - mean) / jnp.sqrt(var + LN_EPS) * gamma + beta
    p = xn @ params["wp"].T + params["bp"]
    p = jnp.where(p >= 0, p, LEAKY_SLOPE * p)

    H = params["wp"].shape[0]
    B = x.shape[1]
    h = jnp.zeros((B, H), jnp.float32)
    for t in range(x.shape[0]):
        gx = p[t] @ params["wih"].T + params["bih"]
        gh = h @ params["whh"].T + params["bhh"]
        r = jax.nn.sigmoid(gx[:, :H] + gh[:, :H])
        z = jax.nn.sigmoid(gx[:, H:2 * H] + gh[:, H:2 * H])
        n = jnp.tanh(gx[:, 2 * H:] + r * gh[:, 2 * H:])
        h = (1.0 - z) * n + z * h
    return h


def _init_params(key, feature_size, hidden_size):
    ks = jax.random.split(key, 6)
    s = 0.1
    return {
        "gamma": jnp.ones((feature_size,), jnp.float32),
        "beta": jnp.zeros((feature_size,), jnp.float32),
        "wp": s * jax.random.normal(ks[0], (hidden_size, feature_size), jnp.float32),
        "bp": s * jax.random.normal(ks[1], (hidden_size,), jnp.float32),
        "wih": s * jax.random.normal(ks[2], (3 * hidden_size, hidden_size), jnp.float32),
        "whh": s * jax.random.normal(ks[3], (3 * hidden_size, hidden_size), jnp.float32),
        "bih": s * jax.random.normal(ks[4], (3 * hidden_size,), jnp.float32),
        "bhh": s * jax.random.normal(ks[5], (3 * hidden_size,), jnp.float32),
    }


if __name__ == "__main__":
    # seq=8, batch=8 (fills the 8-sublane tile), feature=16, hidden=32
    T, B, F, H = 8, 8, 16, 32
    key = jax.random.PRNGKey(0)
    kx, kp = jax.random.split(key)
    x = jax.random.normal(kx, (T, B, F), jnp.float32)
    params = _init_params(kp, F, H)

    out = jax.block_until_ready(feature_extractor(x, params))

    ref = _reference(x, params)
    np.testing.assert_allclose(np.asarray(out), np.asarray(ref), rtol=1e-4, atol=1e-4)
    print("KERNEL_OK")
</pallas_src>

<mosaic_0001>
module attributes {stable_mosaic.version = 11 : i64} {
  func.func @_feature_extractor_kernel(%arg0: memref<8x8x16xf32, #tpu.memory_space<vmem>>, %arg1: memref<1x16xf32, #tpu.memory_space<vmem>>, %arg2: memref<1x16xf32, #tpu.memory_space<vmem>>, %arg3: memref<16x32xf32, #tpu.memory_space<vmem>>, %arg4: memref<1x32xf32, #tpu.memory_space<vmem>>, %arg5: memref<32x32xf32, #tpu.memory_space<vmem>>, %arg6: memref<32x32xf32, #tpu.memory_space<vmem>>, %arg7: memref<32x32xf32, #tpu.memory_space<vmem>>, %arg8: memref<32x32xf32, #tpu.memory_space<vmem>>, %arg9: memref<32x32xf32, #tpu.memory_space<vmem>>, %arg10: memref<32x32xf32, #tpu.memory_space<vmem>>, %arg11: memref<1x32xf32, #tpu.memory_space<vmem>>, %arg12: memref<1x32xf32, #tpu.memory_space<vmem>>, %arg13: memref<1x32xf32, #tpu.memory_space<vmem>>, %arg14: memref<1x32xf32, #tpu.memory_space<vmem>>, %arg15: memref<8x32xf32, #tpu.memory_space<vmem>>, %arg16: memref<8x8x32xf32, #tpu.memory_space<vmem>>, %arg17: memref<8x8x32xf32, #tpu.memory_space<vmem>>, %arg18: memref<8x8x32xf32, #tpu.memory_space<vmem>>) attributes {dimension_semantics = [], scalar_prefetch = 0 : i64, scratch_operands = 3 : i64, tpu.core_type = #tpu.core_type<tc>} {
    %c0 = arith.constant 0 : index
    %c0_0 = arith.constant 0 : index
    %c0_1 = arith.constant 0 : index
    %0 = vector.load %arg0[%c0, %c0_0, %c0_1] : memref<8x8x16xf32, #tpu.memory_space<vmem>>, vector<8x8x16xf32>
    %1 = vector.shape_cast %0 : vector<8x8x16xf32> to vector<64x16xf32>
    %cst = arith.constant dense<0.000000e+00> : vector<64xf32>
    %2 = vector.multi_reduction <add>, %1, %cst [1] : vector<64x16xf32> to vector<64xf32>
    %3 = vector.shape_cast %2 : vector<64xf32> to vector<64x1xf32>
    %cst_2 = arith.constant 1.600000e+01 : f32
    %4 = vector.broadcast %cst_2 : f32 to vector<64x1xf32>
    %5 = arith.divf %3, %4 : vector<64x1xf32>
    %6 = vector.broadcast %5 : vector<64x1xf32> to vector<64x16xf32>
    %7 = arith.subf %1, %6 : vector<64x16xf32>
    %8 = arith.mulf %7, %7 : vector<64x16xf32>
    %cst_3 = arith.constant dense<0.000000e+00> : vector<64xf32>
    %9 = vector.multi_reduction <add>, %8, %cst_3 [1] : vector<64x16xf32> to vector<64xf32>
    %10 = vector.shape_cast %9 : vector<64xf32> to vector<64x1xf32>
    %cst_4 = arith.constant 1.600000e+01 : f32
    %11 = vector.broadcast %cst_4 : f32 to vector<64x1xf32>
    %12 = arith.divf %10, %11 : vector<64x1xf32>
    %cst_5 = arith.constant 9.99999974E-6 : f32
    %13 = vector.broadcast %cst_5 : f32 to vector<64x1xf32>
    %14 = arith.addf %12, %13 : vector<64x1xf32>
    %15 = math.rsqrt %14 : vector<64x1xf32>
    %16 = vector.broadcast %15 : vector<64x1xf32> to vector<64x16xf32>
    %17 = arith.mulf %7, %16 : vector<64x16xf32>
    %c0_6 = arith.constant 0 : index
    %c0_7 = arith.constant 0 : index
    %18 = vector.load %arg1[%c0_6, %c0_7] : memref<1x16xf32, #tpu.memory_space<vmem>>, vector<1x16xf32>
    %19 = vector.broadcast %18 : vector<1x16xf32> to vector<64x16xf32>
    %20 = arith.mulf %17, %19 : vector<64x16xf32>
    %c0_8 = arith.constant 0 : index
    %c0_9 = arith.constant 0 : index
    %21 = vector.load %arg2[%c0_8, %c0_9] : memref<1x16xf32, #tpu.memory_space<vmem>>, vector<1x16xf32>
    %22 = vector.broadcast %21 : vector<1x16xf32> to vector<64x16xf32>
    %23 = arith.addf %20, %22 : vector<64x16xf32>
    %c0_10 = arith.constant 0 : index
    %c0_11 = arith.constant 0 : index
    %24 = vector.load %arg3[%c0_10, %c0_11] : memref<16x32xf32, #tpu.memory_space<vmem>>, vector<16x32xf32>
    %cst_12 = arith.constant dense<0.000000e+00> : vector<64x32xf32>
    %25 = tpu.matmul %23, %24, %cst_12 {dimension_numbers = #tpu.dot_dimension_numbers<[1], [0], [0], [1], [0, 0, 1, 1], [], []>} : vector<64x16xf32>, vector<16x32xf32>, vector<64x32xf32> -> vector<64x32xf32>
    %c0_13 = arith.constant 0 : index
    %c0_14 = arith.constant 0 : index
    %26 = vector.load %arg4[%c0_13, %c0_14] : memref<1x32xf32, #tpu.memory_space<vmem>>, vector<1x32xf32>
    %27 = vector.broadcast %26 : vector<1x32xf32> to vector<64x32xf32>
    %28 = arith.addf %25, %27 : vector<64x32xf32>
    %cst_15 = arith.constant 0.000000e+00 : f32
    %29 = vector.broadcast %cst_15 : f32 to vector<64x32xf32>
    %30 = arith.cmpf oge, %28, %29 : vector<64x32xf32>
    %cst_16 = arith.constant 0.00999999977 : f32
    %31 = vector.broadcast %cst_16 : f32 to vector<64x32xf32>
    %32 = arith.mulf %31, %28 : vector<64x32xf32>
    %33 = arith.select %30, %28, %32 : vector<64x32xi1>, vector<64x32xf32>
    %c0_17 = arith.constant 0 : index
    %c0_18 = arith.constant 0 : index
    %34 = vector.load %arg5[%c0_17, %c0_18] : memref<32x32xf32, #tpu.memory_space<vmem>>, vector<32x32xf32>
    %cst_19 = arith.constant dense<0.000000e+00> : vector<64x32xf32>
    %35 = tpu.matmul %33, %34, %cst_19 {dimension_numbers = #tpu.dot_dimension_numbers<[1], [0], [0], [1], [0, 0, 1, 1], [], []>} : vector<64x32xf32>, vector<32x32xf32>, vector<64x32xf32> -> vector<64x32xf32>
    %c0_20 = arith.constant 0 : index
    %c0_21 = arith.constant 0 : index
    %36 = vector.load %arg11[%c0_20, %c0_21] : memref<1x32xf32, #tpu.memory_space<vmem>>, vector<1x32xf32>
    %37 = vector.broadcast %36 : vector<1x32xf32> to vector<64x32xf32>
    %38 = arith.addf %35, %37 : vector<64x32xf32>
    %39 = vector.shape_cast %38 : vector<64x32xf32> to vector<8x8x32xf32>
    %c0_22 = arith.constant 0 : index
    %c0_23 = arith.constant 0 : index
    %c0_24 = arith.constant 0 : index
    %40 = vector.load %arg16[%c0_22, %c0_23, %c0_24] : memref<8x8x32xf32, #tpu.memory_space<vmem>>, vector<8x8x32xf32>
    tpu.vector_store %arg16[%c0_22, %c0_23, %c0_24], %39 {strides = array<i32>} : memref<8x8x32xf32, #tpu.memory_space<vmem>>, vector<8x8x32xf32>,
    %c0_25 = arith.constant 0 : index
    %c0_26 = arith.constant 0 : index
    %41 = vector.load %arg6[%c0_25, %c0_26] : memref<32x32xf32, #tpu.memory_space<vmem>>, vector<32x32xf32>
    %cst_27 = arith.constant dense<0.000000e+00> : vector<64x32xf32>
    %42 = tpu.matmul %33, %41, %cst_27 {dimension_numbers = #tpu.dot_dimension_numbers<[1], [0], [0], [1], [0, 0, 1, 1], [], []>} : vector<64x32xf32>, vector<32x32xf32>, vector<64x32xf32> -> vector<64x32xf32>
    %c0_28 = arith.constant 0 : index
    %c0_29 = arith.constant 0 : index
    %43 = vector.load %arg12[%c0_28, %c0_29] : memref<1x32xf32, #tpu.memory_space<vmem>>, vector<1x32xf32>
    %44 = vector.broadcast %43 : vector<1x32xf32> to vector<64x32xf32>
    %45 = arith.addf %42, %44 : vector<64x32xf32>
    %46 = vector.shape_cast %45 : vector<64x32xf32> to vector<8x8x32xf32>
    %c0_30 = arith.constant 0 : index
    %c0_31 = arith.constant 0 : index
    %c0_32 = arith.constant 0 : index
    %47 = vector.load %arg17[%c0_30, %c0_31, %c0_32] : memref<8x8x32xf32, #tpu.memory_space<vmem>>, vector<8x8x32xf32>
    tpu.vector_store %arg17[%c0_30, %c0_31, %c0_32], %46 {strides = array<i32>} : memref<8x8x32xf32, #tpu.memory_space<vmem>>, vector<8x8x32xf32>,
    %c0_33 = arith.constant 0 : index
    %c0_34 = arith.constant 0 : index
    %48 = vector.load %arg7[%c0_33, %c0_34] : memref<32x32xf32, #tpu.memory_space<vmem>>, vector<32x32xf32>
    %cst_35 = arith.constant dense<0.000000e+00> : vector<64x32xf32>
    %49 = tpu.matmul %33, %48, %cst_35 {dimension_numbers = #tpu.dot_dimension_numbers<[1], [0], [0], [1], [0, 0, 1, 1], [], []>} : vector<64x32xf32>, vector<32x32xf32>, vector<64x32xf32> -> vector<64x32xf32>
    %c0_36 = arith.constant 0 : index
    %c0_37 = arith.constant 0 : index
    %50 = vector.load %arg13[%c0_36, %c0_37] : memref<1x32xf32, #tpu.memory_space<vmem>>, vector<1x32xf32>
    %51 = vector.broadcast %50 : vector<1x32xf32> to vector<64x32xf32>
    %52 = arith.addf %49, %51 : vector<64x32xf32>
    %53 = vector.shape_cast %52 : vector<64x32xf32> to vector<8x8x32xf32>
    %c0_38 = arith.constant 0 : index
    %c0_39 = arith.constant 0 : index
    %c0_40 = arith.constant 0 : index
    %54 = vector.load %arg18[%c0_38, %c0_39, %c0_40] : memref<8x8x32xf32, #tpu.memory_space<vmem>>, vector<8x8x32xf32>
    tpu.vector_store %arg18[%c0_38, %c0_39, %c0_40], %53 {strides = array<i32>} : memref<8x8x32xf32, #tpu.memory_space<vmem>>, vector<8x8x32xf32>,
    %c0_41 = arith.constant 0 : index
    %c0_42 = arith.constant 0 : index
    %55 = vector.load %arg8[%c0_41, %c0_42] : memref<32x32xf32, #tpu.memory_space<vmem>>, vector<32x32xf32>
    %c0_43 = arith.constant 0 : index
    %c0_44 = arith.constant 0 : index
    %56 = vector.load %arg9[%c0_43, %c0_44] : memref<32x32xf32, #tpu.memory_space<vmem>>, vector<32x32xf32>
    %c0_45 = arith.constant 0 : index
    %c0_46 = arith.constant 0 : index
    %57 = vector.load %arg10[%c0_45, %c0_46] : memref<32x32xf32, #tpu.memory_space<vmem>>, vector<32x32xf32>
    %c0_47 = arith.constant 0 : index
    %c0_48 = arith.constant 0 : index
    %58 = vector.load %arg14[%c0_47, %c0_48] : memref<1x32xf32, #tpu.memory_space<vmem>>, vector<1x32xf32>
    %59 = vector.shape_cast %58 : vector<1x32xf32> to vector<1x32xf32>
    %60 = vector.broadcast %59 : vector<1x32xf32> to vector<8x32xf32>
    %cst_49 = arith.constant 0.000000e+00 : f32
    %61 = vector.broadcast %cst_49 : f32 to vector<8x32xf32>
    %c0_i32 = arith.constant 0 : i32
    %cst_50 = arith.constant dense<0.000000e+00> : vector<8x32xf32>
    %62 = tpu.matmul %61, %55, %cst_50 {dimension_numbers = #tpu.dot_dimension_numbers<[1], [0], [0], [1], [0, 0, 1, 1], [], []>} : vector<8x32xf32>, vector<32x32xf32>, vector<8x32xf32> -> vector<8x32xf32>
    %cst_51 = arith.constant dense<0.000000e+00> : vector<8x32xf32>
    %63 = tpu.matmul %61, %56, %cst_51 {dimension_numbers = #tpu.dot_dimension_numbers<[1], [0], [0], [1], [0, 0, 1, 1], [], []>} : vector<8x32xf32>, vector<32x32xf32>, vector<8x32xf32> -> vector<8x32xf32>
    %cst_52 = arith.constant dense<0.000000e+00> : vector<8x32xf32>
    %64 = tpu.matmul %61, %57, %cst_52 {dimension_numbers = #tpu.dot_dimension_numbers<[1], [0], [0], [1], [0, 0, 1, 1], [], []>} : vector<8x32xf32>, vector<32x32xf32>, vector<8x32xf32> -> vector<8x32xf32>
    %65 = arith.index_cast %c0_i32 : i32 to index
    %c0_53 = arith.constant 0 : index
    %c0_54 = arith.constant 0 : index
    %66 = vector.load %arg16[%65, %c0_53, %c0_54] : memref<8x8x32xf32, #tpu.memory_space<vmem>>, vector<1x8x32xf32>
    %67 = vector.shape_cast %66 : vector<1x8x32xf32> to vector<8x32xf32>
    %68 = arith.addf %67, %62 : vector<8x32xf32>
    %69 = arith.negf %68 : vector<8x32xf32>
    %70 = math.exp %69 : vector<8x32xf32>
    %cst_55 = arith.constant 1.000000e+00 : f32
    %71 = vector.broadcast %cst_55 : f32 to vector<8x32xf32>
    %72 = arith.addf %71, %70 : vector<8x32xf32>
    %73 = arith.divf %71, %72 : vector<8x32xf32>
    %74 = arith.index_cast %c0_i32 : i32 to index
    %c0_56 = arith.constant 0 : index
    %c0_57 = arith.constant 0 : index
    %75 = vector.load %arg17[%74, %c0_56, %c0_57] : memref<8x8x32xf32, #tpu.memory_space<vmem>>, vector<1x8x32xf32>
    %76 = vector.shape_cast %75 : vector<1x8x32xf32> to vector<8x32xf32>
    %77 = arith.addf %76, %63 : vector<8x32xf32>
    %78 = arith.negf %77 : vector<8x32xf32>
    %79 = math.exp %78 : vector<8x32xf32>
    %cst_58 = arith.constant 1.000000e+00 : f32
    %80 = vector.broadcast %cst_58 : f32 to vector<8x32xf32>
    %81 = arith.addf %80, %79 : vector<8x32xf32>
    %82 = arith.divf %80, %81 : vector<8x32xf32>
    %83 = arith.index_cast %c0_i32 : i32 to index
    %c0_59 = arith.constant 0 : index
    %c0_60 = arith.constant 0 : index
    %84 = vector.load %arg18[%83, %c0_59, %c0_60] : memref<8x8x32xf32, #tpu.memory_space<vmem>>, vector<1x8x32xf32>
    %85 = vector.shape_cast %84 : vector<1x8x32xf32> to vector<8x32xf32>
    %86 = arith.addf %64, %60 : vector<8x32xf32>
    %87 = arith.mulf %73, %86 : vector<8x32xf32>
    %88 = arith.addf %85, %87 : vector<8x32xf32>
    %89 = math.tanh %88 : vector<8x32xf32>
    %cst_61 = arith.constant 1.000000e+00 : f32
    %90 = vector.broadcast %cst_61 : f32 to vector<8x32xf32>
    %91 = arith.subf %90, %82 : vector<8x32xf32>
    %92 = arith.mulf %91, %89 : vector<8x32xf32>
    %93 = arith.mulf %82, %61 : vector<8x32xf32>
    %94 = arith.addf %92, %93 : vector<8x32xf32>
    %c1_i32 = arith.constant 1 : i32
    %cst_62 = arith.constant dense<0.000000e+00> : vector<8x32xf32>
    %95 = tpu.matmul %94, %55, %cst_62 {dimension_numbers = #tpu.dot_dimension_numbers<[1], [0], [0], [1], [0, 0, 1, 1], [], []>} : vector<8x32xf32>, vector<32x32xf32>, vector<8x32xf32> -> vector<8x32xf32>
    %cst_63 = arith.constant dense<0.000000e+00> : vector<8x32xf32>
    %96 = tpu.matmul %94, %56, %cst_63 {dimension_numbers = #tpu.dot_dimension_numbers<[1], [0], [0], [1], [0, 0, 1, 1], [], []>} : vector<8x32xf32>, vector<32x32xf32>, vector<8x32xf32> -> vector<8x32xf32>
    %cst_64 = arith.constant dense<0.000000e+00> : vector<8x32xf32>
    %97 = tpu.matmul %94, %57, %cst_64 {dimension_numbers = #tpu.dot_dimension_numbers<[1], [0], [0], [1], [0, 0, 1, 1], [], []>} : vector<8x32xf32>, vector<32x32xf32>, vector<8x32xf32> -> vector<8x32xf32>
    %98 = arith.index_cast %c1_i32 : i32 to index
    %c0_65 = arith.constant 0 : index
    %c0_66 = arith.constant 0 : index
    %99 = vector.load %arg16[%98, %c0_65, %c0_66] : memref<8x8x32xf32, #tpu.memory_space<vmem>>, vector<1x8x32xf32>
    %100 = vector.shape_cast %99 : vector<1x8x32xf32> to vector<8x32xf32>
    %101 = arith.addf %100, %95 : vector<8x32xf32>
    %102 = arith.negf %101 : vector<8x32xf32>
    %103 = math.exp %102 : vector<8x32xf32>
    %cst_67 = arith.constant 1.000000e+00 : f32
    %104 = vector.broadcast %cst_67 : f32 to vector<8x32xf32>
    %105 = arith.addf %104, %103 : vector<8x32xf32>
    %106 = arith.divf %104, %105 : vector<8x32xf32>
    %107 = arith.index_cast %c1_i32 : i32 to index
    %c0_68 = arith.constant 0 : index
    %c0_69 = arith.constant 0 : index
    %108 = vector.load %arg17[%107, %c0_68, %c0_69] : memref<8x8x32xf32, #tpu.memory_space<vmem>>, vector<1x8x32xf32>
    %109 = vector.shape_cast %108 : vector<1x8x32xf32> to vector<8x32xf32>
    %110 = arith.addf %109, %96 : vector<8x32xf32>
    %111 = arith.negf %110 : vector<8x32xf32>
    %112 = math.exp %111 : vector<8x32xf32>
    %cst_70 = arith.constant 1.000000e+00 : f32
    %113 = vector.broadcast %cst_70 : f32 to vector<8x32xf32>
    %114 = arith.addf %113, %112 : vector<8x32xf32>
    %115 = arith.divf %113, %114 : vector<8x32xf32>
    %116 = arith.index_cast %c1_i32 : i32 to index
    %c0_71 = arith.constant 0 : index
    %c0_72 = arith.constant 0 : index
    %117 = vector.load %arg18[%116, %c0_71, %c0_72] : memref<8x8x32xf32, #tpu.memory_space<vmem>>, vector<1x8x32xf32>
    %118 = vector.shape_cast %117 : vector<1x8x32xf32> to vector<8x32xf32>
    %119 = arith.addf %97, %60 : vector<8x32xf32>
    %120 = arith.mulf %106, %119 : vector<8x32xf32>
    %121 = arith.addf %118, %120 : vector<8x32xf32>
    %122 = math.tanh %121 : vector<8x32xf32>
    %cst_73 = arith.constant 1.000000e+00 : f32
    %123 = vector.broadcast %cst_73 : f32 to vector<8x32xf32>
    %124 = arith.subf %123, %115 : vector<8x32xf32>
    %125 = arith.mulf %124, %122 : vector<8x32xf32>
    %126 = arith.mulf %115, %94 : vector<8x32xf32>
    %127 = arith.addf %125, %126 : vector<8x32xf32>
    %c2_i32 = arith.constant 2 : i32
    %cst_74 = arith.constant dense<0.000000e+00> : vector<8x32xf32>
    %128 = tpu.matmul %127, %55, %cst_74 {dimension_numbers = #tpu.dot_dimension_numbers<[1], [0], [0], [1], [0, 0, 1, 1], [], []>} : vector<8x32xf32>, vector<32x32xf32>, vector<8x32xf32> -> vector<8x32xf32>
    %cst_75 = arith.constant dense<0.000000e+00> : vector<8x32xf32>
    %129 = tpu.matmul %127, %56, %cst_75 {dimension_numbers = #tpu.dot_dimension_numbers<[1], [0], [0], [1], [0, 0, 1, 1], [], []>} : vector<8x32xf32>, vector<32x32xf32>, vector<8x32xf32> -> vector<8x32xf32>
    %cst_76 = arith.constant dense<0.000000e+00> : vector<8x32xf32>
    %130 = tpu.matmul %127, %57, %cst_76 {dimension_numbers = #tpu.dot_dimension_numbers<[1], [0], [0], [1], [0, 0, 1, 1], [], []>} : vector<8x32xf32>, vector<32x32xf32>, vector<8x32xf32> -> vector<8x32xf32>
    %131 = arith.index_cast %c2_i32 : i32 to index
    %c0_77 = arith.constant 0 : index
    %c0_78 = arith.constant 0 : index
    %132 = vector.load %arg16[%131, %c0_77, %c0_78] : memref<8x8x32xf32, #tpu.memory_space<vmem>>, vector<1x8x32xf32>
    %133 = vector.shape_cast %132 : vector<1x8x32xf32> to vector<8x32xf32>
    %134 = arith.addf %133, %128 : vector<8x32xf32>
    %135 = arith.negf %134 : vector<8x32xf32>
    %136 = math.exp %135 : vector<8x32xf32>
    %cst_79 = arith.constant 1.000000e+00 : f32
    %137 = vector.broadcast %cst_79 : f32 to vector<8x32xf32>
    %138 = arith.addf %137, %136 : vector<8x32xf32>
    %139 = arith.divf %137, %138 : vector<8x32xf32>
    %140 = arith.index_cast %c2_i32 : i32 to index
    %c0_80 = arith.constant 0 : index
    %c0_81 = arith.constant 0 : index
    %141 = vector.load %arg17[%140, %c0_80, %c0_81] : memref<8x8x32xf32, #tpu.memory_space<vmem>>, vector<1x8x32xf32>
    %142 = vector.shape_cast %141 : vector<1x8x32xf32> to vector<8x32xf32>
    %143 = arith.addf %142, %129 : vector<8x32xf32>
    %144 = arith.negf %143 : vector<8x32xf32>
    %145 = math.exp %144 : vector<8x32xf32>
    %cst_82 = arith.constant 1.000000e+00 : f32
    %146 = vector.broadcast %cst_82 : f32 to vector<8x32xf32>
    %147 = arith.addf %146, %145 : vector<8x32xf32>
    %148 = arith.divf %146, %147 : vector<8x32xf32>
    %149 = arith.index_cast %c2_i32 : i32 to index
    %c0_83 = arith.constant 0 : index
    %c0_84 = arith.constant 0 : index
    %150 = vector.load %arg18[%149, %c0_83, %c0_84] : memref<8x8x32xf32, #tpu.memory_space<vmem>>, vector<1x8x32xf32>
    %151 = vector.shape_cast %150 : vector<1x8x32xf32> to vector<8x32xf32>
    %152 = arith.addf %130, %60 : vector<8x32xf32>
    %153 = arith.mulf %139, %152 : vector<8x32xf32>
    %154 = arith.addf %151, %153 : vector<8x32xf32>
    %155 = math.tanh %154 : vector<8x32xf32>
    %cst_85 = arith.constant 1.000000e+00 : f32
    %156 = vector.broadcast %cst_85 : f32 to vector<8x32xf32>
    %157 = arith.subf %156, %148 : vector<8x32xf32>
    %158 = arith.mulf %157, %155 : vector<8x32xf32>
    %159 = arith.mulf %148, %127 : vector<8x32xf32>
    %160 = arith.addf %158, %159 : vector<8x32xf32>
    %c3_i32 = arith.constant 3 : i32
    %cst_86 = arith.constant dense<0.000000e+00> : vector<8x32xf32>
    %161 = tpu.matmul %160, %55, %cst_86 {dimension_numbers = #tpu.dot_dimension_numbers<[1], [0], [0], [1], [0, 0, 1, 1], [], []>} : vector<8x32xf32>, vector<32x32xf32>, vector<8x32xf32> -> vector<8x32xf32>
    %cst_87 = arith.constant dense<0.000000e+00> : vector<8x32xf32>
    %162 = tpu.matmul %160, %56, %cst_87 {dimension_numbers = #tpu.dot_dimension_numbers<[1], [0], [0], [1], [0, 0, 1, 1], [], []>} : vector<8x32xf32>, vector<32x32xf32>, vector<8x32xf32> -> vector<8x32xf32>
    %cst_88 = arith.constant dense<0.000000e+00> : vector<8x32xf32>
    %163 = tpu.matmul %160, %57, %cst_88 {dimension_numbers = #tpu.dot_dimension_numbers<[1], [0], [0], [1], [0, 0, 1, 1], [], []>} : vector<8x32xf32>, vector<32x32xf32>, vector<8x32xf32> -> vector<8x32xf32>
    %164 = arith.index_cast %c3_i32 : i32 to index
    %c0_89 = arith.constant 0 : index
    %c0_90 = arith.constant 0 : index
    %165 = vector.load %arg16[%164, %c0_89, %c0_90] : memref<8x8x32xf32, #tpu.memory_space<vmem>>, vector<1x8x32xf32>
    %166 = vector.shape_cast %165 : vector<1x8x32xf32> to vector<8x32xf32>
    %167 = arith.addf %166, %161 : vector<8x32xf32>
    %168 = arith.negf %167 : vector<8x32xf32>
    %169 = math.exp %168 : vector<8x32xf32>
    %cst_91 = arith.constant 1.000000e+00 : f32
    %170 = vector.broadcast %cst_91 : f32 to vector<8x32xf32>
    %171 = arith.addf %170, %169 : vector<8x32xf32>
    %172 = arith.divf %170, %171 : vector<8x32xf32>
    %173 = arith.index_cast %c3_i32 : i32 to index
    %c0_92 = arith.constant 0 : index
    %c0_93 = arith.constant 0 : index
    %174 = vector.load %arg17[%173, %c0_92, %c0_93] : memref<8x8x32xf32, #tpu.memory_space<vmem>>, vector<1x8x32xf32>
    %175 = vector.shape_cast %174 : vector<1x8x32xf32> to vector<8x32xf32>
    %176 = arith.addf %175, %162 : vector<8x32xf32>
    %177 = arith.negf %176 : vector<8x32xf32>
    %178 = math.exp %177 : vector<8x32xf32>
    %cst_94 = arith.constant 1.000000e+00 : f32
    %179 = vector.broadcast %cst_94 : f32 to vector<8x32xf32>
    %180 = arith.addf %179, %178 : vector<8x32xf32>
    %181 = arith.divf %179, %180 : vector<8x32xf32>
    %182 = arith.index_cast %c3_i32 : i32 to index
    %c0_95 = arith.constant 0 : index
    %c0_96 = arith.constant 0 : index
    %183 = vector.load %arg18[%182, %c0_95, %c0_96] : memref<8x8x32xf32, #tpu.memory_space<vmem>>, vector<1x8x32xf32>
    %184 = vector.shape_cast %183 : vector<1x8x32xf32> to vector<8x32xf32>
    %185 = arith.addf %163, %60 : vector<8x32xf32>
    %186 = arith.mulf %172, %185 : vector<8x32xf32>
    %187 = arith.addf %184, %186 : vector<8x32xf32>
    %188 = math.tanh %187 : vector<8x32xf32>
    %cst_97 = arith.constant 1.000000e+00 : f32
    %189 = vector.broadcast %cst_97 : f32 to vector<8x32xf32>
    %190 = arith.subf %189, %181 : vector<8x32xf32>
    %191 = arith.mulf %190, %188 : vector<8x32xf32>
    %192 = arith.mulf %181, %160 : vector<8x32xf32>
    %193 = arith.addf %191, %192 : vector<8x32xf32>
    %c4_i32 = arith.constant 4 : i32
    %cst_98 = arith.constant dense<0.000000e+00> : vector<8x32xf32>
    %194 = tpu.matmul %193, %55, %cst_98 {dimension_numbers = #tpu.dot_dimension_numbers<[1], [0], [0], [1], [0, 0, 1, 1], [], []>} : vector<8x32xf32>, vector<32x32xf32>, vector<8x32xf32> -> vector<8x32xf32>
    %cst_99 = arith.constant dense<0.000000e+00> : vector<8x32xf32>
    %195 = tpu.matmul %193, %56, %cst_99 {dimension_numbers = #tpu.dot_dimension_numbers<[1], [0], [0], [1], [0, 0, 1, 1], [], []>} : vector<8x32xf32>, vector<32x32xf32>, vector<8x32xf32> -> vector<8x32xf32>
    %cst_100 = arith.constant dense<0.000000e+00> : vector<8x32xf32>
    %196 = tpu.matmul %193, %57, %cst_100 {dimension_numbers = #tpu.dot_dimension_numbers<[1], [0], [0], [1], [0, 0, 1, 1], [], []>} : vector<8x32xf32>, vector<32x32xf32>, vector<8x32xf32> -> vector<8x32xf32>
    %197 = arith.index_cast %c4_i32 : i32 to index
    %c0_101 = arith.constant 0 : index
    %c0_102 = arith.constant 0 : index
    %198 = vector.load %arg16[%197, %c0_101, %c0_102] : memref<8x8x32xf32, #tpu.memory_space<vmem>>, vector<1x8x32xf32>
    %199 = vector.shape_cast %198 : vector<1x8x32xf32> to vector<8x32xf32>
    %200 = arith.addf %199, %194 : vector<8x32xf32>
    %201 = arith.negf %200 : vector<8x32xf32>
    %202 = math.exp %201 : vector<8x32xf32>
    %cst_103 = arith.constant 1.000000e+00 : f32
    %203 = vector.broadcast %cst_103 : f32 to vector<8x32xf32>
    %204 = arith.addf %203, %202 : vector<8x32xf32>
    %205 = arith.divf %203, %204 : vector<8x32xf32>
    %206 = arith.index_cast %c4_i32 : i32 to index
    %c0_104 = arith.constant 0 : index
    %c0_105 = arith.constant 0 : index
    %207 = vector.load %arg17[%206, %c0_104, %c0_105] : memref<8x8x32xf32, #tpu.memory_space<vmem>>, vector<1x8x32xf32>
    %208 = vector.shape_cast %207 : vector<1x8x32xf32> to vector<8x32xf32>
    %209 = arith.addf %208, %195 : vector<8x32xf32>
    %210 = arith.negf %209 : vector<8x32xf32>
    %211 = math.exp %210 : vector<8x32xf32>
    %cst_106 = arith.constant 1.000000e+00 : f32
    %212 = vector.broadcast %cst_106 : f32 to vector<8x32xf32>
    %213 = arith.addf %212, %211 : vector<8x32xf32>
    %214 = arith.divf %212, %213 : vector<8x32xf32>
    %215 = arith.index_cast %c4_i32 : i32 to index
    %c0_107 = arith.constant 0 : index
    %c0_108 = arith.constant 0 : index
    %216 = vector.load %arg18[%215, %c0_107, %c0_108] : memref<8x8x32xf32, #tpu.memory_space<vmem>>, vector<1x8x32xf32>
    %217 = vector.shape_cast %216 : vector<1x8x32xf32> to vector<8x32xf32>
    %218 = arith.addf %196, %60 : vector<8x32xf32>
    %219 = arith.mulf %205, %218 : vector<8x32xf32>
    %220 = arith.addf %217, %219 : vector<8x32xf32>
    %221 = math.tanh %220 : vector<8x32xf32>
    %cst_109 = arith.constant 1.000000e+00 : f32
    %222 = vector.broadcast %cst_109 : f32 to vector<8x32xf32>
    %223 = arith.subf %222, %214 : vector<8x32xf32>
    %224 = arith.mulf %223, %221 : vector<8x32xf32>
    %225 = arith.mulf %214, %193 : vector<8x32xf32>
    %226 = arith.addf %224, %225 : vector<8x32xf32>
    %c5_i32 = arith.constant 5 : i32
    %cst_110 = arith.constant dense<0.000000e+00> : vector<8x32xf32>
    %227 = tpu.matmul %226, %55, %cst_110 {dimension_numbers = #tpu.dot_dimension_numbers<[1], [0], [0], [1], [0, 0, 1, 1], [], []>} : vector<8x32xf32>, vector<32x32xf32>, vector<8x32xf32> -> vector<8x32xf32>
    %cst_111 = arith.constant dense<0.000000e+00> : vector<8x32xf32>
    %228 = tpu.matmul %226, %56, %cst_111 {dimension_numbers = #tpu.dot_dimension_numbers<[1], [0], [0], [1], [0, 0, 1, 1], [], []>} : vector<8x32xf32>, vector<32x32xf32>, vector<8x32xf32> -> vector<8x32xf32>
    %cst_112 = arith.constant dense<0.000000e+00> : vector<8x32xf32>
    %229 = tpu.matmul %226, %57, %cst_112 {dimension_numbers = #tpu.dot_dimension_numbers<[1], [0], [0], [1], [0, 0, 1, 1], [], []>} : vector<8x32xf32>, vector<32x32xf32>, vector<8x32xf32> -> vector<8x32xf32>
    %230 = arith.index_cast %c5_i32 : i32 to index
    %c0_113 = arith.constant 0 : index
    %c0_114 = arith.constant 0 : index
    %231 = vector.load %arg16[%230, %c0_113, %c0_114] : memref<8x8x32xf32, #tpu.memory_space<vmem>>, vector<1x8x32xf32>
    %232 = vector.shape_cast %231 : vector<1x8x32xf32> to vector<8x32xf32>
    %233 = arith.addf %232, %227 : vector<8x32xf32>
    %234 = arith.negf %233 : vector<8x32xf32>
    %235 = math.exp %234 : vector<8x32xf32>
    %cst_115 = arith.constant 1.000000e+00 : f32
    %236 = vector.broadcast %cst_115 : f32 to vector<8x32xf32>
    %237 = arith.addf %236, %235 : vector<8x32xf32>
    %238 = arith.divf %236, %237 : vector<8x32xf32>
    %239 = arith.index_cast %c5_i32 : i32 to index
    %c0_116 = arith.constant 0 : index
    %c0_117 = arith.constant 0 : index
    %240 = vector.load %arg17[%239, %c0_116, %c0_117] : memref<8x8x32xf32, #tpu.memory_space<vmem>>, vector<1x8x32xf32>
    %241 = vector.shape_cast %240 : vector<1x8x32xf32> to vector<8x32xf32>
    %242 = arith.addf %241, %228 : vector<8x32xf32>
    %243 = arith.negf %242 : vector<8x32xf32>
    %244 = math.exp %243 : vector<8x32xf32>
    %cst_118 = arith.constant 1.000000e+00 : f32
    %245 = vector.broadcast %cst_118 : f32 to vector<8x32xf32>
    %246 = arith.addf %245, %244 : vector<8x32xf32>
    %247 = arith.divf %245, %246 : vector<8x32xf32>
    %248 = arith.index_cast %c5_i32 : i32 to index
    %c0_119 = arith.constant 0 : index
    %c0_120 = arith.constant 0 : index
    %249 = vector.load %arg18[%248, %c0_119, %c0_120] : memref<8x8x32xf32, #tpu.memory_space<vmem>>, vector<1x8x32xf32>
    %250 = vector.shape_cast %249 : vector<1x8x32xf32> to vector<8x32xf32>
    %251 = arith.addf %229, %60 : vector<8x32xf32>
    %252 = arith.mulf %238, %251 : vector<8x32xf32>
    %253 = arith.addf %250, %252 : vector<8x32xf32>
    %254 = math.tanh %253 : vector<8x32xf32>
    %cst_121 = arith.constant 1.000000e+00 : f32
    %255 = vector.broadcast %cst_121 : f32 to vector<8x32xf32>
    %256 = arith.subf %255, %247 : vector<8x32xf32>
    %257 = arith.mulf %256, %254 : vector<8x32xf32>
    %258 = arith.mulf %247, %226 : vector<8x32xf32>
    %259 = arith.addf %257, %258 : vector<8x32xf32>
    %c6_i32 = arith.constant 6 : i32
    %cst_122 = arith.constant dense<0.000000e+00> : vector<8x32xf32>
    %260 = tpu.matmul %259, %55, %cst_122 {dimension_numbers = #tpu.dot_dimension_numbers<[1], [0], [0], [1], [0, 0, 1, 1], [], []>} : vector<8x32xf32>, vector<32x32xf32>, vector<8x32xf32> -> vector<8x32xf32>
    %cst_123 = arith.constant dense<0.000000e+00> : vector<8x32xf32>
    %261 = tpu.matmul %259, %56, %cst_123 {dimension_numbers = #tpu.dot_dimension_numbers<[1], [0], [0], [1], [0, 0, 1, 1], [], []>} : vector<8x32xf32>, vector<32x32xf32>, vector<8x32xf32> -> vector<8x32xf32>
    %cst_124 = arith.constant dense<0.000000e+00> : vector<8x32xf32>
    %262 = tpu.matmul %259, %57, %cst_124 {dimension_numbers = #tpu.dot_dimension_numbers<[1], [0], [0], [1], [0, 0, 1, 1], [], []>} : vector<8x32xf32>, vector<32x32xf32>, vector<8x32xf32> -> vector<8x32xf32>
    %263 = arith.index_cast %c6_i32 : i32 to index
    %c0_125 = arith.constant 0 : index
    %c0_126 = arith.constant 0 : index
    %264 = vector.load %arg16[%263, %c0_125, %c0_126] : memref<8x8x32xf32, #tpu.memory_space<vmem>>, vector<1x8x32xf32>
    %265 = vector.shape_cast %264 : vector<1x8x32xf32> to vector<8x32xf32>
    %266 = arith.addf %265, %260 : vector<8x32xf32>
    %267 = arith.negf %266 : vector<8x32xf32>
    %268 = math.exp %267 : vector<8x32xf32>
    %cst_127 = arith.constant 1.000000e+00 : f32
    %269 = vector.broadcast %cst_127 : f32 to vector<8x32xf32>
    %270 = arith.addf %269, %268 : vector<8x32xf32>
    %271 = arith.divf %269, %270 : vector<8x32xf32>
    %272 = arith.index_cast %c6_i32 : i32 to index
    %c0_128 = arith.constant 0 : index
    %c0_129 = arith.constant 0 : index
    %273 = vector.load %arg17[%272, %c0_128, %c0_129] : memref<8x8x32xf32, #tpu.memory_space<vmem>>, vector<1x8x32xf32>
    %274 = vector.shape_cast %273 : vector<1x8x32xf32> to vector<8x32xf32>
    %275 = arith.addf %274, %261 : vector<8x32xf32>
    %276 = arith.negf %275 : vector<8x32xf32>
    %277 = math.exp %276 : vector<8x32xf32>
    %cst_130 = arith.constant 1.000000e+00 : f32
    %278 = vector.broadcast %cst_130 : f32 to vector<8x32xf32>
    %279 = arith.addf %278, %277 : vector<8x32xf32>
    %280 = arith.divf %278, %279 : vector<8x32xf32>
    %281 = arith.index_cast %c6_i32 : i32 to index
    %c0_131 = arith.constant 0 : index
    %c0_132 = arith.constant 0 : index
    %282 = vector.load %arg18[%281, %c0_131, %c0_132] : memref<8x8x32xf32, #tpu.memory_space<vmem>>, vector<1x8x32xf32>
    %283 = vector.shape_cast %282 : vector<1x8x32xf32> to vector<8x32xf32>
    %284 = arith.addf %262, %60 : vector<8x32xf32>
    %285 = arith.mulf %271, %284 : vector<8x32xf32>
    %286 = arith.addf %283, %285 : vector<8x32xf32>
    %287 = math.tanh %286 : vector<8x32xf32>
    %cst_133 = arith.constant 1.000000e+00 : f32
    %288 = vector.broadcast %cst_133 : f32 to vector<8x32xf32>
    %289 = arith.subf %288, %280 : vector<8x32xf32>
    %290 = arith.mulf %289, %287 : vector<8x32xf32>
    %291 = arith.mulf %280, %259 : vector<8x32xf32>
    %292 = arith.addf %290, %291 : vector<8x32xf32>
    %c7_i32 = arith.constant 7 : i32
    %cst_134 = arith.constant dense<0.000000e+00> : vector<8x32xf32>
    %293 = tpu.matmul %292, %55, %cst_134 {dimension_numbers = #tpu.dot_dimension_numbers<[1], [0], [0], [1], [0, 0, 1, 1], [], []>} : vector<8x32xf32>, vector<32x32xf32>, vector<8x32xf32> -> vector<8x32xf32>
    %cst_135 = arith.constant dense<0.000000e+00> : vector<8x32xf32>
    %294 = tpu.matmul %292, %56, %cst_135 {dimension_numbers = #tpu.dot_dimension_numbers<[1], [0], [0], [1], [0, 0, 1, 1], [], []>} : vector<8x32xf32>, vector<32x32xf32>, vector<8x32xf32> -> vector<8x32xf32>
    %cst_136 = arith.constant dense<0.000000e+00> : vector<8x32xf32>
    %295 = tpu.matmul %292, %57, %cst_136 {dimension_numbers = #tpu.dot_dimension_numbers<[1], [0], [0], [1], [0, 0, 1, 1], [], []>} : vector<8x32xf32>, vector<32x32xf32>, vector<8x32xf32> -> vector<8x32xf32>
    %296 = arith.index_cast %c7_i32 : i32 to index
    %c0_137 = arith.constant 0 : index
    %c0_138 = arith.constant 0 : index
    %297 = vector.load %arg16[%296, %c0_137, %c0_138] : memref<8x8x32xf32, #tpu.memory_space<vmem>>, vector<1x8x32xf32>
    %298 = vector.shape_cast %297 : vector<1x8x32xf32> to vector<8x32xf32>
    %299 = arith.addf %298, %293 : vector<8x32xf32>
    %300 = arith.negf %299 : vector<8x32xf32>
    %301 = math.exp %300 : vector<8x32xf32>
    %cst_139 = arith.constant 1.000000e+00 : f32
    %302 = vector.broadcast %cst_139 : f32 to vector<8x32xf32>
    %303 = arith.addf %302, %301 : vector<8x32xf32>
    %304 = arith.divf %302, %303 : vector<8x32xf32>
    %305 = arith.index_cast %c7_i32 : i32 to index
    %c0_140 = arith.constant 0 : index
    %c0_141 = arith.constant 0 : index
    %306 = vector.load %arg17[%305, %c0_140, %c0_141] : memref<8x8x32xf32, #tpu.memory_space<vmem>>, vector<1x8x32xf32>
    %307 = vector.shape_cast %306 : vector<1x8x32xf32> to vector<8x32xf32>
    %308 = arith.addf %307, %294 : vector<8x32xf32>
    %309 = arith.negf %308 : vector<8x32xf32>
    %310 = math.exp %309 : vector<8x32xf32>
    %cst_142 = arith.constant 1.000000e+00 : f32
    %311 = vector.broadcast %cst_142 : f32 to vector<8x32xf32>
    %312 = arith.addf %311, %310 : vector<8x32xf32>
    %313 = arith.divf %311, %312 : vector<8x32xf32>
    %314 = arith.index_cast %c7_i32 : i32 to index
    %c0_143 = arith.constant 0 : index
    %c0_144 = arith.constant 0 : index
    %315 = vector.load %arg18[%314, %c0_143, %c0_144] : memref<8x8x32xf32, #tpu.memory_space<vmem>>, vector<1x8x32xf32>
    %316 = vector.shape_cast %315 : vector<1x8x32xf32> to vector<8x32xf32>
    %317 = arith.addf %295, %60 : vector<8x32xf32>
    %318 = arith.mulf %304, %317 : vector<8x32xf32>
    %319 = arith.addf %316, %318 : vector<8x32xf32>
    %320 = math.tanh %319 : vector<8x32xf32>
    %cst_145 = arith.constant 1.000000e+00 : f32
    %321 = vector.broadcast %cst_145 : f32 to vector<8x32xf32>
    %322 = arith.subf %321, %313 : vector<8x32xf32>
    %323 = arith.mulf %322, %320 : vector<8x32xf32>
    %324 = arith.mulf %313, %292 : vector<8x32xf32>
    %325 = arith.addf %323, %324 : vector<8x32xf32>
    %c8_i32 = arith.constant 8 : i32
    %c0_146 = arith.constant 0 : index
    %c0_147 = arith.constant 0 : index
    %326 = vector.load %arg15[%c0_146, %c0_147] : memref<8x32xf32, #tpu.memory_space<vmem>>, vector<8x32xf32>
    tpu.vector_store %arg15[%c0_146, %c0_147], %325 {strides = array<i32>} : memref<8x32xf32, #tpu.memory_space<vmem>>, vector<8x32xf32>,
    return
  }
}

</mosaic_0001>

<bundles_post_ra>
// kernel: tpu_custom_call.1
= control target key start
LH: loop header
LB: loop body
LE: loop exit
PB: predicated region body
PF: predicated region fallthrough
CT: control target
= control target key end

     0   :  { %20 = vsyncpa [#allocation6], 0  ;;  %s4483_s0 = inlined_call_operand.hbm [shape: f32[8,8,16], index: 0, kind: input, shape index: {}]   ;;  %s4484_s1 = inlined_call_operand.vmem [shape: f32[1,16], index: 1, kind: input, shape index: {}]   ;;  %s4485_s2 = inlined_call_operand.vmem [shape: f32[1,16], index: 2, kind: input, shape index: {}]   ;;  %s4486_s3 = inlined_call_operand.hbm [shape: f32[16,32], index: 3, kind: input, shape index: {}]   ;;  %s4487_s4 = inlined_call_operand.hbm [shape: f32[1,32], index: 4, kind: input, shape index: {}]   ;;  %s4488_s5 = inlined_call_operand.hbm [shape: f32[32,32], index: 5, kind: input, shape index: {}]   ;;  %s4489_s6 = inlined_call_operand.hbm [shape: f32[32,32], index: 6, kind: input, shape index: {}]   ;;  %s4490_s7 = inlined_call_operand.hbm [shape: f32[32,32], index: 7, kind: input, shape index: {}]   ;;  %s4491_s8 = inlined_call_operand.hbm [shape: f32[32,32], index: 8, kind: input, shape index: {}]   ;;  %s4492_s9 = inlined_call_operand.vmem [shape: f32[32,32], index: 9, kind: input, shape index: {}]   ;;  %s4493_s10 = inlined_call_operand.hbm [shape: f32[32,32], index: 10, kind: input, shape index: {}]   ;;  %s4494_s11 = inlined_call_operand.vmem [shape: f32[1,32], index: 11, kind: input, shape index: {}]   ;;  %s4495_s12 = inlined_call_operand.vmem [shape: f32[1,32], index: 12, kind: input, shape index: {}]   ;;  %s4496_s13 = inlined_call_operand.vmem [shape: f32[1,32], index: 13, kind: input, shape index: {}]   ;;  %s4497_s14 = inlined_call_operand.vmem [shape: f32[1,32], index: 14, kind: input, shape index: {}]   ;;  %s4498_s15 = inlined_call_operand.hbm [shape: f32[8,32], index: 15, kind: output, shape index: {}]  }
   0x1   :  { %21 = vsyncpa [#allocation9], 0 }
   0x2   :  { %22 = vsyncpa [#allocation12], 0 }
   0x3   :  { %23 = vsyncpa [#allocation15], 0 }
   0x4   :  { %24 = vsyncpa [#allocation18], 0 }
   0x5   :  { %25 = vsyncpa [#allocation7], 0  ;;  %s3891_s18 = smov [#allocation8]   ;;  %s3892_s20 = smov [#allocation11]  }
   0x6   :  { %s47_s19 = sshll.u32 %s3891_s18, 4  ;;  %s69_s21 = sshll.u32 %s3892_s20, 4  ;;  %s48_s19 = int_to_ptr.vmem [resolvable:$true] %s47_s19  ;;  %s3985_s21 = int_to_ptr.vmem [resolvable:$true] %s69_s21 }
   0x7   :  { %s3681_s24 = scalar_lea.hbm %s4486_s3, 256 }
   0x8   :  { %p3682_p0 = scmp.ne.s32.totalorder %s4486_s3, %s3681_s24  ;;  %p3685_p1 = scmp.lt.u32.totalorder %s3681_s24, %s4486_s3 }
   0xa   :  { %p3687_p2 = pnand %p3685_p1, %p3682_p0 }
   0xc   :  { %3690 = shalt.err (!%p3687_p2)
}
   0xd   :  { %s3691_s29 = scalar_lea.vmem %s48_s19, 256  ;;  %p3696_p4 = scmp.lt.s32.totalorder %s48_s19, %s48_s19 }
   0xe   :  { %p3692_p3 = scmp.ne.s32.totalorder %s48_s19, %s3691_s29  ;;  %p3697_p5 = scmp.lt.s32.totalorder %s3691_s29, %s3691_s29 }
  0x10   :  { %p3698_p6 = por %p3697_p5, %p3696_p4 }
  0x12   :  { %p3699_p7 = pnand %p3698_p6, %p3692_p3 }
  0x14   :  { %3702 = shalt.err (!%p3699_p7)
}
  0x15   :  { %s3893_s30 = smov 128   ;;  %s3894_s16 = smov 8  }
  0x16   :  { %53 = dma.hbm_to_vmem [thread:$0]  %s4486_s3, 256, %s48_s19, [#allocation9], %s3893_s30, %s3893_s30, %s3894_s16  }
  0x17   :  { %s3703_s23 = scalar_lea.hbm %s4488_s5, 512 }
  0x18   :  { %p3704_p8 = scmp.ne.s32.totalorder %s4488_s5, %s3703_s23  ;;  %p3707_p9 = scmp.lt.u32.totalorder %s3703_s23, %s4488_s5 }
  0x1a   :  { %p3709_p10 = pnand %p3707_p9, %p3704_p8 }
  0x1c   :  { %3712 = shalt.err (!%p3709_p10)
}
  0x1d   :  { %s3713_s28 = scalar_lea.vmem %s3985_s21, 512  ;;  %p3718_p12 = scmp.lt.s32.totalorder %s3985_s21, %s3985_s21 }
  0x1e   :  { %p3714_p11 = scmp.ne.s32.totalorder %s3985_s21, %s3713_s28  ;;  %p3719_p13 = scmp.lt.s32.totalorder %s3713_s28, %s3713_s28 }
  0x20   :  { %p3720_p0 = por %p3719_p13, %p3718_p12 }
  0x22   :  { %p3721_p1 = pnand %p3720_p0, %p3714_p11 }
  0x24   :  { %3724 = shalt.err (!%p3721_p1)
}
  0x25   :  { %75 = dma.hbm_to_vmem [thread:$0]  %s4488_s5, 512, %s3985_s21, [#allocation12], %s3893_s30, %s3893_s30, %s3894_s16  }
  0x26   :  { %s3895_s29 = smov [#allocation14]   ;;  %s3896_s18 = smov [#allocation5]  }
  0x27   :  { %s93_s17 = sshll.u32 %s3895_s29, 4  ;;  %s31_s20 = sshll.u32 %s3896_s18, 4  ;;  %s94_s17 = int_to_ptr.vmem [resolvable:$true] %s93_s17  ;;  %s4022_s20 = int_to_ptr.vmem [resolvable:$true] %s31_s20 }
  0x28   :  { %s3725_s24 = scalar_lea.hbm %s4490_s7, 512 }
  0x29   :  { %p3726_p2 = scmp.ne.s32.totalorder %s4490_s7, %s3725_s24  ;;  %p3729_p3 = scmp.lt.u32.totalorder %s3725_s24, %s4490_s7 }
  0x2b   :  { %p3731_p4 = pnand %p3729_p3, %p3726_p2 }
  0x2d   :  { %3734 = shalt.err (!%p3731_p4)
}
  0x2e   :  { %s3735_s5 = scalar_lea.vmem %s94_s17, 512  ;;  %p3740_p6 = scmp.lt.s32.totalorder %s94_s17, %s94_s17 }
  0x2f   :  { %p3736_p5 = scmp.ne.s32.totalorder %s94_s17, %s3735_s5  ;;  %p3741_p7 = scmp.lt.s32.totalorder %s3735_s5, %s3735_s5 }
  0x31   :  { %p3742_p8 = por %p3741_p7, %p3740_p6 }
  0x33   :  { %p3743_p9 = pnand %p3742_p8, %p3736_p5 }
  0x35   :  { %3746 = shalt.err (!%p3743_p9)
}
  0x36   :  { %99 = dma.hbm_to_vmem [thread:$0]  %s4490_s7, 512, %s94_s17, [#allocation15], %s3893_s30, %s3893_s30, %s3894_s16  }
  0x37   :  { %s3747_s18 = scalar_lea.hbm %s4483_s0, 1024 }
  0x38   :  { %p3748_p10 = scmp.ne.s32.totalorder %s4483_s0, %s3747_s18  ;;  %p3751_p11 = scmp.lt.u32.totalorder %s3747_s18, %s4483_s0 }
  0x3a   :  { %p3753_p12 = pnand %p3751_p11, %p3748_p10 }
  0x3c   :  { %3756 = shalt.err (!%p3753_p12)
}
  0x3d   :  { %s3757_s26 = scalar_lea.vmem %s4022_s20, 1024  ;;  %p3762_p0 = scmp.lt.s32.totalorder %s4022_s20, %s4022_s20 }
  0x3e   :  { %p3758_p13 = scmp.ne.s32.totalorder %s4022_s20, %s3757_s26  ;;  %p3763_p1 = scmp.lt.s32.totalorder %s3757_s26, %s3757_s26 }
  0x40   :  { %p3764_p2 = por %p3763_p1, %p3762_p0 }
  0x42   :  { %p3765_p3 = pnand %p3764_p2, %p3758_p13 }
  0x44   :  { %3768 = shalt.err (!%p3765_p3)
}
  0x45   :  { %37 = dma.hbm_to_vmem [thread:$0]  %s4483_s0, 1024, %s4022_s20, [#allocation6], %s3893_s30, %s3893_s30, %s3894_s16  }
  0x46   :  { %s3897_s27 = smov [#allocation10]   ;;  %s3898_s5 = smov [#allocation13]  }
  0x47   :  { %s60_s28 = sshll.u32 %s3897_s27, 4  ;;  %s81_s21 = sshll.u32 %s3898_s5, 4  ;;  %s61_s28 = int_to_ptr.vmem [resolvable:$true] %s60_s28  ;;  %s4059_s21 = int_to_ptr.vmem [resolvable:$true] %s81_s21 }
  0x48   :  { %s3769_s29 = scalar_lea.hbm %s4487_s4, 16 }
  0x49   :  { %p3770_p4 = scmp.ne.s32.totalorder %s4487_s4, %s3769_s29  ;;  %p3773_p5 = scmp.lt.u32.totalorder %s3769_s29, %s4487_s4 }
  0x4b   :  { %p3775_p6 = pnand %p3773_p5, %p3770_p4 }
  0x4d   :  { %3778 = shalt.err (!%p3775_p6)
}
  0x4e   :  { %s3779_s0 = scalar_lea.vmem %s61_s28, 16  ;;  %s3783_s20 = scalar_lea.vmem %s61_s28, 32 }
  0x4f   :  { %p3780_p7 = scmp.ne.s32.totalorder %s61_s28, %s3779_s0  ;;  %p3784_p8 = scmp.lt.s32.totalorder %s61_s28, %s61_s28 }
  0x50   :  { %p3785_p9 = scmp.lt.s32.totalorder %s3783_s20, %s3779_s0 }
  0x52   :  { %p3786_p10 = por %p3785_p9, %p3784_p8 }
  0x54   :  { %p3787_p11 = pnand %p3786_p10, %p3780_p7 }
  0x56   :  { %3790 = shalt.err (!%p3787_p11)
}
  0x57   :  { %63 = dma.hbm_to_vmem [thread:$0]  %s4487_s4, 16, %s61_s28, [#allocation9]  }
  0x58   :  { %s3791_s27 = scalar_lea.hbm %s4489_s6, 512 }
  0x59   :  { %p3792_p12 = scmp.ne.s32.totalorder %s4489_s6, %s3791_s27  ;;  %p3795_p13 = scmp.lt.u32.totalorder %s3791_s27, %s4489_s6 }
  0x5b   :  { %p3797_p0 = pnand %p3795_p13, %p3792_p12 }
  0x5d   :  { %3800 = shalt.err (!%p3797_p0)
}
  0x5e   :  { %s3801_s18 = scalar_lea.vmem %s4059_s21, 512  ;;  %p3806_p2 = scmp.lt.s32.totalorder %s4059_s21, %s4059_s21 }
  0x5f   :  { %p3802_p1 = scmp.ne.s32.totalorder %s4059_s21, %s3801_s18  ;;  %p3807_p3 = scmp.lt.s32.totalorder %s3801_s18, %s3801_s18 }
  0x61   :  { %p3808_p4 = por %p3807_p3, %p3806_p2 }
  0x63   :  { %p3809_p5 = pnand %p3808_p4, %p3802_p1 }
  0x65   :  { %3812 = shalt.err (!%p3809_p5)
}
  0x66   :  { %87 = dma.hbm_to_vmem [thread:$0]  %s4489_s6, 512, %s4059_s21, [#allocation12], %s3893_s30, %s3893_s30, %s3894_s16  }
  0x67   :  { %s3899_s22 = smov [#allocation16]   ;;  %s3900_s24 = smov [#allocation17]  }
  0x68   :  { %s105_s23 = sshll.u32 %s3899_s22, 4  ;;  %s119_s0 = sshll.u32 %s3900_s24, 4  ;;  %s106_s23 = int_to_ptr.vmem [resolvable:$true] %s105_s23  ;;  %s4093_s0 = int_to_ptr.vmem [resolvable:$true] %s119_s0 }
  0x69   :  { %s3813_s26 = scalar_lea.hbm %s4491_s8, 512 }
  0x6a   :  { %p3814_p6 = scmp.ne.s32.totalorder %s4491_s8, %s3813_s26  ;;  %p3817_p7 = scmp.lt.u32.totalorder %s3813_s26, %s4491_s8 }
  0x6c   :  { %p3819_p8 = pnand %p3817_p7, %p3814_p6 }
  0x6e   :  { %3822 = shalt.err (!%p3819_p8)
}
  0x6f   :  { %s3823_s6 = scalar_lea.vmem %s106_s23, 512  ;;  %p3828_p10 = scmp.lt.s32.totalorder %s106_s23, %s106_s23 }
  0x70   :  { %p3824_p9 = scmp.ne.s32.totalorder %s106_s23, %s3823_s6  ;;  %p3829_p11 = scmp.lt.s32.totalorder %s3823_s6, %s3823_s6 }
  0x72   :  { %p3830_p12 = por %p3829_p11, %p3828_p10 }
  0x74   :  { %p3831_p13 = pnand %p3830_p12, %p3824_p9 }
  0x76   :  { %3834 = shalt.err (!%p3831_p13)
}
  0x77   :  { %111 = dma.hbm_to_vmem [thread:$0]  %s4491_s8, 512, %s106_s23, [#allocation15], %s3893_s30, %s3893_s30, %s3894_s16  }
  0x78   :  { %s3835_s18 = scalar_lea.hbm %s4493_s10, 512 }
  0x79   :  { %p3836_p0 = scmp.ne.s32.totalorder %s4493_s10, %s3835_s18  ;;  %p3839_p1 = scmp.lt.u32.totalorder %s3835_s18, %s4493_s10 }
  0x7b   :  { %p3841_p2 = pnand %p3839_p1, %p3836_p0 }
  0x7d   :  { %3844 = shalt.err (!%p3841_p2)
}
  0x7e   :  { %s3845_s20 = scalar_lea.vmem %s4093_s0, 512  ;;  %p3850_p4 = scmp.lt.s32.totalorder %s4093_s0, %s4093_s0 }
  0x7f   :  { %p3846_p3 = scmp.ne.s32.totalorder %s4093_s0, %s3845_s20  ;;  %p3851_p5 = scmp.lt.s32.totalorder %s3845_s20, %s3845_s20 }
  0x81   :  { %p3852_p6 = por %p3851_p5, %p3850_p4 }
  0x83   :  { %p3853_p7 = pnand %p3852_p6, %p3846_p3 }
  0x85   :  { %3856 = shalt.err (!%p3853_p7)
}
  0x86   :  { %125 = dma.hbm_to_vmem [thread:$0]  %s4493_s10, 512, %s4093_s0, [#allocation18], %s3893_s30, %s3893_s30, %s3894_s16  }
  0x87   :  { %3879 = dma.done.wait [#allocation6], 1024  }
  0x88   :  { %3880 = vsyncadd [#allocation6], 4294966272 }
  0x89   :  { %3881 = dma.done.wait [#allocation9], 272  }
  0x8a   :  { %3882 = vsyncadd [#allocation9], 4294967024 }
  0x8b   :  { %3883 = dma.done.wait [#allocation12], 1024  }
  0x8c   :  { %3884 = vsyncadd [#allocation12], 4294966272 }
  0x8d   :  { %3885 = dma.done.wait [#allocation15], 1024  }
  0x8e   :  { %3886 = vsyncadd [#allocation15], 4294966272 }
  0x8f   :  { %3887 = dma.done.wait [#allocation18], 512  }
  0x90   :  { %3888 = vsyncadd [#allocation18], 4294966784  ;;  %vm166_vm0 = vcmask 130048   ;;  %v158_v0 = vld [vmem:[#allocation5] sm:$0xff]  ;;  %v160_v1 = vld [vmem:[#allocation5 + $0x10] sm:$0xff]  ;;  %vm475_vm3 = vcmask 261120  }
  0x91   :  { %v159_v2 = vld [vmem:[#allocation5 + $0x8] sm:$0xff]  ;;  %v167_v3 = vsel %vm166_vm0, %v158_v0, 0.0  ;;  %v173_v4 = vsel %vm166_vm0, %v160_v1, 0.0  ;;  %v161_v5 = vld [vmem:[#allocation5 + $0x18] sm:$0xff]  ;;  %v162_v8 = vld [vmem:[#allocation5 + $0x20] sm:$0xff]  ;;  %vm3902_vm10 = vmmov 0  }
  0x92   :  { %168 = vadd.xlane.f32.xlu0 %v167_v3  ;;  %174 = vadd.xlane.f32.xlu1 %v173_v4  ;;  %v170_v6 = vsel %vm166_vm0, %v159_v2, 0.0  ;;  %v176_v7 = vsel %vm166_vm0, %v161_v5, 0.0  ;;  %v163_v9 = vld [vmem:[#allocation5 + $0x28] sm:$0xff]  ;;  %v179_v10 = vsel %vm166_vm0, %v162_v8, 0.0  ;;  %v164_v12 = vld [vmem:[#allocation5 + $0x30] sm:$0xff]  ;;  %v165_v13 = vld [vmem:[#allocation5 + $0x38] sm:$0xff] }
  0x93   :  { %v182_v11 = vsel %vm166_vm0, %v163_v9, 0.0  ;;  %v185_v14 = vsel %vm166_vm0, %v164_v12, 0.0  ;;  %v188_v15 = vsel %vm166_vm0, %v165_v13, 0.0  ;;  %v302_v56 = vld [vmem:[#allocation8] sm:$0xff]  ;;  %v303_v57 = vld [vmem:[#allocation8 + $0x8] sm:$0xff]  ;;  %v613_v59 = vld [vmem:[#allocation13] sm:$0xff] }
  0x94   :  { %v3399_v58 = vpack.c.bf16 %v303_v57, %v302_v56  ;;  %v614_v60 = vld [vmem:[#allocation13 + $0x8] sm:$0xff]  ;;  %v464_v61 = vld [vmem:[#allocation11] sm:$0xff] }
  0x95   :  { %v3411_v62 = vpack.c.bf16 %v614_v60, %v613_v59  ;;  %v465_v63 = vld [vmem:[#allocation11 + $0x8] sm:$0xff] }
  0x96   :  { %171 = vadd.xlane.f32.xlu0 %v170_v6  ;;  %177 = vadd.xlane.f32.xlu1 %v176_v7 }
  0x97   :  { %3400 = vmatprep.subr.bf16.mxu0 %v3399_v58 }
  0x98   :  { %3402 = vmatpush3.bf16.msra.mxu0 %v3399_v58 }
  0x99   :  { %3412 = vmatprep.subr.bf16.mxu0 %v3411_v62 }
  0x9a   :  { %180 = vadd.xlane.f32.xlu0 %v179_v10  ;;  %183 = vadd.xlane.f32.xlu1 %v182_v11 }
  0x9e   :  { %186 = vadd.xlane.f32.xlu0 %v185_v14  ;;  %189 = vadd.xlane.f32.xlu1 %v188_v15 }
 0x11f   :  { %v169_v16 = vpop.xlane.xlu0 %168  ;;  %v175_v17 = vpop.xlane.xlu1 %174 }
 0x120   :  { %v192_v18 = vmul.f32 0.0625, %v169_v16  ;;  %v194_v19 = vmul.f32 0.0625, %v175_v17 }
 0x122   :  { %v4138_v20 = vsub.f32 %v158_v0, %v192_v18  ;;  %v4140_v21 = vsub.f32 %v160_v1, %v194_v19  ;;  %v3403_v0 = vpack.c.bf16 %v465_v63, %v464_v61  ;;  %v616_v61 = vld [vmem:[#allocation13 + $0x18] sm:$0xff] }
 0x123   :  { %v172_v22 = vpop.xlane.xlu0 %171  ;;  %v178_v23 = vpop.xlane.xlu1 %177 }
 0x124   :  { %v193_v24 = vmul.f32 0.0625, %v172_v22  ;;  %v195_v25 = vmul.f32 0.0625, %v178_v23  ;;  %v208_v26 = vmul.f32 %v4138_v20, %v4138_v20  ;;  %v210_v27 = vmul.f32 %v4140_v21, %v4140_v21  ;;  %3404 = vmatprep.subr.bf16.mxu1 %v3403_v0 }
 0x125   :  { %3406 = vmatpush3.bf16.msra.mxu1 %v3403_v0  ;;  %v467_v0 = vld [vmem:[#allocation11 + $0x18] sm:$0xff] }
 0x126   :  { %v4146_v28 = vsub.f32 %v159_v2, %v193_v24  ;;  %v4148_v29 = vsub.f32 %v161_v5, %v195_v25  ;;  %v216_v30 = vsel %vm166_vm0, %v208_v26, 0.0  ;;  %v222_v33 = vsel %vm166_vm0, %v210_v27, 0.0  ;;  %v2817_v25 = vld [vmem:[%s4484_s1] ss:$0 sm:$0xff] }
 0x127   :  { %217 = vadd.xlane.f32.xlu0 %v216_v30  ;;  %v181_v31 = vpop.xlane.xlu0 %180  ;;  %v184_v32 = vpop.xlane.xlu1 %183 }
 0x128   :  { %v196_v34 = vmul.f32 0.0625, %v181_v31  ;;  %v197_v35 = vmul.f32 0.0625, %v184_v32  ;;  %v209_v36 = vmul.f32 %v4146_v28, %v4146_v28  ;;  %v211_v37 = vmul.f32 %v4148_v29, %v4148_v29  ;;  %v2818_v31 = vld [vmem:[%s4485_s2] ss:$0 sm:$0xff] }
 0x12a   :  { %v4156_v38 = vsub.f32 %v162_v8, %v196_v34  ;;  %v4158_v39 = vsub.f32 %v163_v9, %v197_v35  ;;  %v219_v40 = vsel %vm166_vm0, %v209_v36, 0.0  ;;  %v225_v43 = vsel %vm166_vm0, %v211_v37, 0.0 }
 0x12b   :  { %223 = vadd.xlane.f32.xlu0 %v222_v33  ;;  %220 = vadd.xlane.f32.xlu1 %v219_v40  ;;  %v187_v41 = vpop.xlane.xlu0 %186  ;;  %v190_v42 = vpop.xlane.xlu1 %189 }
 0x12c   :  { %v198_v44 = vmul.f32 0.0625, %v187_v41  ;;  %v199_v45 = vmul.f32 0.0625, %v190_v42  ;;  %v212_v46 = vmul.f32 %v4156_v38, %v4156_v38  ;;  %v213_v47 = vmul.f32 %v4158_v39, %v4158_v39 }
 0x12e   :  { %v4166_v48 = vsub.f32 %v164_v12, %v198_v44  ;;  %v4168_v49 = vsub.f32 %v165_v13, %v199_v45  ;;  %v228_v50 = vsel %vm166_vm0, %v212_v46, 0.0  ;;  %v231_v51 = vsel %vm166_vm0, %v213_v47, 0.0 }
 0x12f   :  { %226 = vadd.xlane.f32.xlu1 %v225_v43  ;;  %229 = vadd.xlane.f32.xlu0 %v228_v50 }
 0x130   :  { %v214_v52 = vmul.f32 %v4166_v48, %v4166_v48  ;;  %v215_v53 = vmul.f32 %v4168_v49, %v4168_v49 }
 0x132   :  { %v234_v54 = vsel %vm166_vm0, %v214_v52, 0.0  ;;  %v237_v55 = vsel %vm166_vm0, %v215_v53, 0.0 }
 0x133   :  { %232 = vadd.xlane.f32.xlu1 %v231_v51  ;;  %235 = vadd.xlane.f32.xlu0 %v234_v54 }
 0x137   :  { %238 = vadd.xlane.f32.xlu1 %v237_v55 }
 0x1b4   :  { %v218_v1 = vpop.xlane.xlu0 %217 }
 0x1b5   :  { %v240_v2 = vmul.f32 0.0625, %v218_v1 }
 0x1b7   :  { %v248_v3 = vadd.f32 1e-05, %v240_v2  ;;  %v738_v2 = vld [vmem:[#allocation14 + $0x8] sm:$0xff] }
 0x1b8   :  { %v221_v4 = vpop.xlane.xlu1 %220  ;;  %v224_v5 = vpop.xlane.xlu0 %223 }
 0x1b9   :  { %3585 = vrsqrt.f32 %v248_v3  ;;  %v241_v6 = vmul.f32 0.0625, %v221_v4  ;;  %v242_v7 = vmul.f32 0.0625, %v224_v5  ;;  %v3901_v4 = vmov 0.0|0.0   ;;  %v2819_v5 = vld [vmem:[#allocation10] ss:$0 sm:$0xff] }
 0x1bb   :  { %v249_v8 = vadd.f32 1e-05, %v241_v6  ;;  %v250_v9 = vadd.f32 1e-05, %v242_v7 }
 0x1bc   :  { %v227_v10 = vpop.xlane.xlu1 %226  ;;  %v230_v11 = vpop.xlane.xlu0 %229 }
 0x1bd   :  { %3587 = vrsqrt.f32 %v249_v8  ;;  %v243_v12 = vmul.f32 0.0625, %v227_v10  ;;  %v244_v13 = vmul.f32 0.0625, %v230_v11  ;;  %v861_v10 = vld [vmem:[#allocation16] sm:$0xff]  ;;  %v862_v11 = vld [vmem:[#allocation16 + $0x8] sm:$0xff] }
 0x1be   :  { %3589 = vrsqrt.f32 %v250_v9 }
 0x1bf   :  { %v251_v14 = vadd.f32 1e-05, %v243_v12  ;;  %v252_v15 = vadd.f32 1e-05, %v244_v13  ;;  %v739_v13 = vld [vmem:[#allocation14 + $0x10] sm:$0xff] }
 0x1c0   :  { %v233_v16 = vpop.xlane.xlu1 %232  ;;  %v236_v17 = vpop.xlane.xlu0 %235 }
 0x1c1   :  { %3591 = vrsqrt.f32 %v251_v14  ;;  %v245_v18 = vmul.f32 0.0625, %v233_v16  ;;  %v246_v19 = vmul.f32 0.0625, %v236_v17  ;;  %v740_v14 = vld [vmem:[#allocation14 + $0x18] sm:$0xff] }
 0x1c2   :  { %3593 = vrsqrt.f32 %v252_v15 }
 0x1c3   :  { %v3586_v22 = vpop.eup %3585  ;;  %v253_v23 = vadd.f32 1e-05, %v245_v18  ;;  %v254_v24 = vadd.f32 1e-05, %v246_v19  ;;  %v4201_v19 = vpack.c.bf16 %v862_v11, %v861_v10 }
 0x1c4   :  { %v239_v26 = vpop.xlane.xlu1 %238  ;;  %v264_v27 = vmul.f32 %v3586_v22, %v4138_v20 }
 0x1c5   :  { %3595 = vrsqrt.f32 %v253_v23  ;;  %v247_v30 = vmul.f32 0.0625, %v239_v26  ;;  %v864_v26 = vld [vmem:[#allocation16 + $0x18] sm:$0xff] }
 0x1c6   :  { %3597 = vrsqrt.f32 %v254_v24  ;;  %v279_v32 = vmul.f32 %v2817_v25, %v264_v27  ;;  %v3423_v24 = vpack.c.bf16 %v740_v14, %v739_v13 }
 0x1c7   :  { %v3588_v33 = vpop.eup %3587  ;;  %v255_v34 = vadd.f32 1e-05, %v247_v30 }
 0x1c8   :  { %v3590_v35 = vpop.eup %3589  ;;  %v294_v36 = vadd.f32 %v2818_v31, %v279_v32  ;;  %v265_v37 = vmul.f32 %v3588_v33, %v4146_v28 }
 0x1c9   :  { %3599 = vrsqrt.f32 %v255_v34  ;;  %v266_v40 = vmul.f32 %v3590_v35, %v4140_v21 }
 0x1ca   :  { %3063 = vmatprep.mubr.msk.f32.mxu0 %vm166_vm0, %v294_v36  ;;  %v280_v20 = vmul.f32 %v2817_v25, %v265_v37 }
 0x1cb   :  { %v3592_v41 = vpop.eup %3591  ;;  %v281_v42 = vmul.f32 %v2817_v25, %v266_v40 }
 0x1cc   :  { %v3594_v43 = vpop.eup %3593  ;;  %v295_v44 = vadd.f32 %v2818_v31, %v280_v20  ;;  %v267_v45 = vmul.f32 %v3592_v41, %v4148_v29 }
 0x1cd   :  { %v296_v46 = vadd.f32 %v2818_v31, %v281_v42  ;;  %v268_v47 = vmul.f32 %v3594_v43, %v4156_v38 }
 0x1ce   :  { %3064 = vmatmul.mubr.msk.f32.vlgmr.msra.gmra.mrb[0].mxu0 %vm166_vm0, %v295_v44  ;;  %v282_v50 = vmul.f32 %v2817_v25, %v267_v45 }
 0x1cf   :  { %v3596_v51 = vpop.eup %3595  ;;  %3066 = vmatprep.mubr.msk.f32.mxu0 %vm166_vm0, %v296_v46  ;;  %v283_v28 = vmul.f32 %v2817_v25, %v268_v47  ;;  %3414 = vmatpush3.bf16.msra.mxu0 %v3411_v62  ;;  %v466_v62 = vld [vmem:[#allocation11 + $0x10] sm:$0xff] }
 0x1d0   :  { %v3598_v21 = vpop.eup %3597  ;;  %v297_v52 = vadd.f32 %v2818_v31, %v282_v50  ;;  %v269_v53 = vmul.f32 %v3596_v51, %v4158_v39  ;;  %v3407_v1 = vpack.c.bf16 %v467_v0, %v466_v62  ;;  %v2837_v62 = vld [vmem:[%s4495_s12] ss:$0 sm:$0xff] }
 0x1d1   :  { %v298_v54 = vadd.f32 %v2818_v31, %v283_v28  ;;  %v270_v55 = vmul.f32 %v3598_v21, %v4166_v48  ;;  %v615_v48 = vld [vmem:[#allocation13 + $0x10] sm:$0xff] }
 0x1d2   :  { %3067 = vmatmul.mubr.msk.f32.gmra.mrb[2].mxu0 %vm166_vm0, %v297_v52  ;;  %v284_v29 = vmul.f32 %v2817_v25, %v269_v53  ;;  %v3415_v63 = vpack.c.bf16 %v616_v61, %v615_v48  ;;  %3408 = vmatprep.subr.bf16.mxu1 %v3407_v1  ;;  %v865_v21 = vld [vmem:[%s4492_s9] sm:$0xff]  ;;  %v866_v52 = vld [vmem:[%s4492_s9 + $0x8] sm:$0xff] }
 0x1d3   :  { %v3600_v56 = vpop.eup %3599  ;;  %3069 = vmatprep.mubr.msk.f32.mxu0 %vm166_vm0, %v298_v54  ;;  %v285_v38 = vmul.f32 %v2817_v25, %v270_v55  ;;  %3410 = vmatpush3.bf16.msra.mxu1 %v3407_v1  ;;  %v869_v54 = vld [vmem:[#allocation17] sm:$0xff]  ;;  %v870_v55 = vld [vmem:[#allocation17 + $0x8] sm:$0xff] }
 0x1d4   :  { %v299_v57 = vadd.f32 %v2818_v31, %v284_v29  ;;  %v271_v58 = vmul.f32 %v3600_v56, %v4168_v49  ;;  %3416 = vmatprep.subr.bf16.mxu0 %v3415_v63  ;;  %v737_v49 = vld [vmem:[#allocation14] sm:$0xff]  ;;  %v3903_v29 = vmov 0.0   ;;  %v4242_v56 = vpack.c.bf16 %v866_v52, %v865_v21  ;;  %v2828_v61 = vld [vmem:[%s4494_s11] ss:$0 sm:$0xff] }
 0x1d5   :  { %v300_v59 = vadd.f32 %v2818_v31, %v285_v38  ;;  %3418 = vmatpush3.bf16.msra.mxu0 %v3415_v63  ;;  %v3419_v3 = vpack.c.bf16 %v738_v2, %v737_v49  ;;  %v867_v38 = vld [vmem:[%s4492_s9 + $0x10] sm:$0xff] }
 0x1d6   :  { %3070 = vmatmul.mubr.msk.f32.gmra.mrb[4].mxu0 %vm166_vm0, %v299_v57  ;;  %v286_v60 = vmul.f32 %v2817_v25, %v271_v58  ;;  %3427 = vmatprep.subr.bf16.mxu0 %v3901_v4  ;;  %v863_v25 = vld [vmem:[#allocation16 + $0x10] sm:$0xff]  ;;  %v868_v57 = vld [vmem:[%s4492_s9 + $0x18] sm:$0xff]  ;;  %v4250_v58 = vpack.c.bf16 %v870_v55, %v869_v54 }
 0x1d7   :  { %3072 = vmatprep.mubr.msk.f32.mxu0 %vm166_vm0, %v300_v59  ;;  %3420 = vmatprep.subr.bf16.mxu1 %v3419_v3  ;;  %v4213_v35 = vpack.c.bf16 %v864_v26, %v863_v25  ;;  %v871_v59 = vld [vmem:[#allocation17 + $0x10] sm:$0xff] }
 0x1d8   :  { %v301_v39 = vadd.f32 %v2818_v31, %v286_v60  ;;  %v872_v60 = vld [vmem:[#allocation17 + $0x18] sm:$0xff] }
 0x1d9   :  { %v4261_v48 = vpack.c.bf16 %v872_v60, %v871_v59 }
 0x1da   :  { %3073 = vmatmul.mubr.msk.f32.gmra.mrb[6].mxu0 %vm166_vm0, %v301_v39  ;;  %v4257_v39 = vpack.c.bf16 %v868_v57, %v867_v38 }
 0x2a1   :  { %v3065_v6 = vpop.f32.mrb[0].mxu0 }
 0x2a2   :  { %v407_v7 = vadd.f32 %v3065_v6, %v2819_v5  ;;  %v401_v8 = vpop.f32.mrb[1].mxu0 }
 0x2a3   :  { %v402_v9 = vadd.f32 %v2819_v5, %v401_v8 }
 0x2a4   :  { %v449_v12 = vmul.f32 0.01, %v407_v7  ;;  %vm441_vm1 = vcmp.ge.f32.partialorder %v407_v7, 0.0 }
 0x2a5   :  { %v448_v15 = vmul.f32 0.01, %v402_v9  ;;  %v3068_v16 = vpop.f32.mrb[2].mxu0  ;;  %vm440_vm2 = vcmp.ge.f32.partialorder %v402_v9, 0.0 }
 0x2a6   :  { %v417_v17 = vadd.f32 %v3068_v16, %v2819_v5  ;;  %v411_v18 = vpop.f32.mrb[3].mxu0  ;;  %v4206_v30 = vsel %vm441_vm1, %v407_v7, %v449_v12 }
 0x2a7   :  { %v412_v22 = vadd.f32 %v2819_v5, %v411_v18  ;;  %v456_v23 = vsel %vm440_vm2, %v402_v9, %v448_v15 }
 0x2a8   :  { %v451_v27 = vmul.f32 0.01, %v417_v17  ;;  %3083 = vmatprep.mubr.msk.f32.mxu1 %vm475_vm3, %v456_v23  ;;  %3103 = vmatprep.mubr.msk.f32.mxu0 %vm475_vm3, %v456_v23  ;;  %vm443_vm4 = vcmp.ge.f32.partialorder %v417_v17, 0.0 }
 0x2a9   :  { %vm442_vm5 = vcmp.ge.f32.partialorder %v412_v22, 0.0  ;;  %v450_v31 = vmul.f32 0.01, %v412_v22  ;;  %v3071_v32 = vpop.f32.mrb[4].mxu0  ;;  %3084 = vmatmul.mubr.msk.f32.vlgmr.msra.gmra.mrb[0].mxu1 %vm475_vm3, %v4206_v30  ;;  %3104 = vmatmul.mubr.msk.f32.vlgmr.msra.gmra.mrb[8].mxu0 %vm475_vm3, %v4206_v30 }
 0x2aa   :  { %v427_v33 = vadd.f32 %v3071_v32, %v2819_v5  ;;  %3422 = vmatpush3.bf16.msra.mxu1 %v3419_v3  ;;  %v421_v34 = vpop.f32.mrb[5].mxu0  ;;  %3429 = vmatpush3.bf16.msra.mxu0 %v4201_v19  ;;  %v459_v20 = vsel %vm443_vm4, %v417_v17, %v451_v27 }
 0x2ab   :  { %v422_v36 = vadd.f32 %v2819_v5, %v421_v34  ;;  %v458_v37 = vsel %vm442_vm5, %v412_v22, %v450_v31  ;;  %3424 = vmatprep.subr.bf16.mxu1 %v3423_v24  ;;  %3430 = vmatprep.subr.bf16.mxu0 %v3901_v4 }
 0x2ac   :  { %v453_v40 = vmul.f32 0.01, %v427_v33  ;;  %3086 = vmatprep.mubr.msk.f32.mxu1 %vm475_vm3, %v458_v37  ;;  %3106 = vmatprep.mubr.msk.f32.mxu0 %vm475_vm3, %v458_v37  ;;  %vm445_vm6 = vcmp.ge.f32.partialorder %v427_v33, 0.0 }
 0x2ad   :  { %vm444_vm7 = vcmp.ge.f32.partialorder %v422_v36, 0.0  ;;  %v452_v41 = vmul.f32 0.01, %v422_v36  ;;  %v3074_v42 = vpop.f32.mrb[6].mxu0  ;;  %3087 = vmatmul.mubr.msk.f32.gmra.mrb[2].mxu1 %vm475_vm3, %v459_v20  ;;  %3107 = vmatmul.mubr.msk.f32.gmra.mrb[10].mxu0 %vm475_vm3, %v459_v20 }
 0x2ae   :  { %v437_v43 = vadd.f32 %v3074_v42, %v2819_v5  ;;  %v431_v44 = vpop.f32.mrb[7].mxu0  ;;  %3426 = vmatpush3.bf16.msra.mxu1 %v3423_v24  ;;  %3432 = vmatpush3.bf16.msra.mxu0 %v4213_v35  ;;  %v461_v50 = vsel %vm445_vm6, %v427_v33, %v453_v40 }
 0x2af   :  { %v432_v45 = vadd.f32 %v2819_v5, %v431_v44  ;;  %v460_v46 = vsel %vm444_vm7, %v422_v36, %v452_v41  ;;  %3433 = vmatprep.subr.bf16.mxu1 %v3901_v4  ;;  %3439 = vmatprep.subr.bf16.mxu0 %v3901_v4 }
 0x2b0   :  { %v455_v47 = vmul.f32 0.01, %v437_v43  ;;  %3089 = vmatprep.mubr.msk.f32.mxu1 %vm475_vm3, %v460_v46  ;;  %3109 = vmatprep.mubr.msk.f32.mxu0 %vm475_vm3, %v460_v46  ;;  %vm447_vm8 = vcmp.ge.f32.partialorder %v437_v43, 0.0 }
 0x2b1   :  { %vm446_vm9 = vcmp.ge.f32.partialorder %v432_v45, 0.0  ;;  %v454_v51 = vmul.f32 0.01, %v432_v45  ;;  %3090 = vmatmul.mubr.msk.f32.gmra.mrb[4].mxu1 %vm475_vm3, %v461_v50  ;;  %3110 = vmatmul.mubr.msk.f32.gmra.mrb[12].mxu0 %vm475_vm3, %v461_v50 }
 0x2b2   :  { %v463_v53 = vsel %vm447_vm8, %v437_v43, %v455_v47 }
 0x2b3   :  { %v462_v28 = vsel %vm446_vm9, %v432_v45, %v454_v51 }
 0x2b4   :  { %3092 = vmatprep.mubr.msk.f32.mxu1 %vm475_vm3, %v462_v28  ;;  %3112 = vmatprep.mubr.msk.f32.mxu0 %vm475_vm3, %v462_v28 }
 0x2b5   :  { %3093 = vmatmul.mubr.msk.f32.gmra.mrb[6].mxu1 %vm475_vm3, %v463_v53  ;;  %3113 = vmatmul.mubr.msk.f32.gmra.mrb[14].mxu0 %vm475_vm3, %v463_v53 }
 0x2b6   :  { %3123 = vmatprep.mubr.msk.f32.mxu1 %vm475_vm3, %v456_v23  ;;  %3143 = vmatprep.mubr.msk.f32.mxu0 %vm3902_vm10, %v3903_v29 }
 0x2b9   :  { %3124 = vmatmul.mubr.msk.f32.vlgmr.msra.gmra.mrb[8].mxu1 %vm475_vm3, %v4206_v30  ;;  %3144 = vmatmul.mubr.f32.vlgmr.msra.gmra.mrb[16].mxu0 %v3903_v29 }
 0x2ba   :  { %3435 = vmatpush3.bf16.msra.mxu1 %v4242_v56  ;;  %3126 = vmatprep.mubr.msk.f32.mxu1 %vm475_vm3, %v458_v37  ;;  %v2846_v37 = vld [vmem:[%s4496_s13] ss:$0 sm:$0xff] }
 0x2bb   :  { %3436 = vmatprep.subr.bf16.mxu1 %v3901_v4  ;;  %3441 = vmatpush3.bf16.msra.mxu0 %v4250_v58 }
 0x2bc   :  { %3442 = vmatprep.subr.bf16.mxu0 %v3901_v4  ;;  %3165 = vmatprep.mubr.msk.f32.mxu0 %vm3902_vm10, %v3903_v29 }
 0x2bd   :  { %3127 = vmatmul.mubr.msk.f32.gmra.mrb[10].mxu1 %vm475_vm3, %v459_v20 }
 0x2be   :  { %3129 = vmatprep.mubr.msk.f32.mxu1 %vm475_vm3, %v460_v46  ;;  %3438 = vmatpush3.bf16.msra.mxu1 %v4257_v39 }
 0x2bf   :  { %3444 = vmatpush3.bf16.msra.mxu0 %v4261_v48  ;;  %3445 = vmatprep.subr.bf16.mxu1 %v3901_v4 }
 0x2c0   :  { %3451 = vmatprep.subr.bf16.mxu0 %v3901_v4 }
 0x2c1   :  { %3130 = vmatmul.mubr.msk.f32.gmra.mrb[12].mxu1 %vm475_vm3, %v461_v50 }
 0x2c2   :  { %3132 = vmatprep.mubr.msk.f32.mxu1 %vm475_vm3, %v462_v28  ;;  %3166 = vmatmul.mubr.f32.vlgmr.msra.gmra.mrb[18].mxu0 %v3903_v29 }
 0x2c3   :  { %3453 = vmatpush3.bf16.msra.mxu0 %v4242_v56  ;;  %3187 = vmatprep.mubr.msk.f32.mxu0 %vm3902_vm10, %v3903_v29 }
 0x2c4   :  { %3454 = vmatprep.subr.bf16.mxu0 %v3901_v4 }
 0x2c5   :  { %3133 = vmatmul.mubr.msk.f32.gmra.mrb[14].mxu1 %vm475_vm3, %v463_v53 }
 0x2c6   :  { %3154 = vmatprep.mubr.msk.f32.mxu1 %vm3902_vm10, %v3903_v29 }
 0x2c7   :  { %3456 = vmatpush3.bf16.msra.mxu0 %v4257_v39 }
 0x2c8   :  { %3463 = vmatprep.subr.bf16.mxu0 %v3901_v4 }
 0x2c9   :  { %3155 = vmatmul.mubr.f32.vlgmr.msra.gmra.mrb[16].mxu1 %v3903_v29 }
 0x2ca   :  { %3447 = vmatpush3.bf16.msra.mxu1 %v4201_v19  ;;  %3176 = vmatprep.mubr.msk.f32.mxu1 %vm3902_vm10, %v3903_v29 }
 0x2cb   :  { %3448 = vmatprep.subr.bf16.mxu1 %v3901_v4 }
 0x2ce   :  { %3450 = vmatpush3.bf16.msra.mxu1 %v4213_v35 }
 0x2cf   :  { %3457 = vmatprep.subr.bf16.mxu1 %v3901_v4 }
 0x37c   :  { %v3085_v63 = vpop.f32.mrb[0].mxu1  ;;  %v3105_v0 = vpop.f32.mrb[8].mxu0 }
 0x37d   :  { %v572_v1 = vadd.f32 %v3085_v63, %v2828_v61  ;;  %v696_v49 = vadd.f32 %v3105_v0, %v2837_v62  ;;  %v566_v2 = vpop.f32.mrb[1].mxu1  ;;  %v690_v3 = vpop.f32.mrb[9].mxu0 }
 0x37e   :  { %v567_v5 = vadd.f32 %v2828_v61, %v566_v2  ;;  %v691_v6 = vadd.f32 %v2837_v62, %v690_v3 }
 0x37f   :  { %606 = vst.msk [vmem:[#allocation2 + $0x8] sm:$0xff] %vm475_vm3, %v572_v1  ;;  %730 = vst.msk [vmem:[#allocation3 + $0x8] sm:$0xff] %vm475_vm3, %v696_v49 }
 0x380   :  { %605 = vst.msk [vmem:[#allocation2] sm:$0xff] %vm475_vm3, %v567_v5  ;;  %729 = vst.msk [vmem:[#allocation3] sm:$0xff] %vm475_vm3, %v691_v6  ;;  %v3088_v7 = vpop.f32.mrb[2].mxu1  ;;  %v3108_v8 = vpop.f32.mrb[10].mxu0  ;;  %v4327_v6 = vld [vmem:[%s4497_s14] ss:$0 sm:$0xff] }
 0x381   :  { %v582_v9 = vadd.f32 %v3088_v7, %v2828_v61  ;;  %v706_v10 = vadd.f32 %v3108_v8, %v2837_v62  ;;  %v576_v11 = vpop.f32.mrb[3].mxu1  ;;  %v700_v12 = vpop.f32.mrb[11].mxu0  ;;  %s3904_s14 = smov [#allocation19]  }
 0x382   :  { %v577_v13 = vadd.f32 %v2828_v61, %v576_v11  ;;  %v701_v14 = vadd.f32 %v2837_v62, %v700_v12  ;;  %s2804_s29 = sshll.u32 %s3904_s14, 4  ;;  %s2805_s29 = int_to_ptr.vmem [resolvable:$true] %s2804_s29 }
 0x383   :  { %608 = vst.msk [vmem:[#allocation2 + $0x18] sm:$0xff] %vm475_vm3, %v582_v9  ;;  %732 = vst.msk [vmem:[#allocation3 + $0x18] sm:$0xff] %vm475_vm3, %v706_v10  ;;  %s3857_s18 = scalar_lea.vmem %s2805_s29, 128  ;;  %p3862_p9 = scmp.lt.s32.totalorder %s2805_s29, %s2805_s29 }
 0x384   :  { %607 = vst.msk [vmem:[#allocation2 + $0x10] sm:$0xff] %vm475_vm3, %v577_v13  ;;  %731 = vst.msk [vmem:[#allocation3 + $0x10] sm:$0xff] %vm475_vm3, %v701_v14  ;;  %v3091_v15 = vpop.f32.mrb[4].mxu1  ;;  %v3111_v16 = vpop.f32.mrb[12].mxu0  ;;  %p3858_p8 = scmp.ne.s32.totalorder %s2805_s29, %s3857_s18  ;;  %p3863_p10 = scmp.lt.s32.totalorder %s3857_s18, %s3857_s18 }
 0x385   :  { %v592_v17 = vadd.f32 %v3091_v15, %v2828_v61  ;;  %v716_v18 = vadd.f32 %v3111_v16, %v2837_v62  ;;  %v586_v22 = vpop.f32.mrb[5].mxu1  ;;  %v710_v23 = vpop.f32.mrb[13].mxu0 }
 0x386   :  { %v587_v24 = vadd.f32 %v2828_v61, %v586_v22  ;;  %v711_v25 = vadd.f32 %v2837_v62, %v710_v23  ;;  %p3864_p11 = por %p3863_p10, %p3862_p9 }
 0x387   :  { %610 = vst.msk [vmem:[#allocation2 + $0x28] sm:$0xff] %vm475_vm3, %v592_v17  ;;  %734 = vst.msk [vmem:[#allocation3 + $0x28] sm:$0xff] %vm475_vm3, %v716_v18  ;;  %v1023_v41 = vld [vmem:[#allocation2] sm:$0xff] }
 0x388   :  { %609 = vst.msk [vmem:[#allocation2 + $0x20] sm:$0xff] %vm475_vm3, %v587_v24  ;;  %733 = vst.msk [vmem:[#allocation3 + $0x20] sm:$0xff] %vm475_vm3, %v711_v25  ;;  %v3094_v26 = vpop.f32.mrb[6].mxu1  ;;  %v3114_v27 = vpop.f32.mrb[14].mxu0  ;;  %v1031_v49 = vld [vmem:[#allocation3] sm:$0xff]  ;;  %v1261_v24 = vld [vmem:[#allocation2 + $0x8] sm:$0xff]  ;;  %p3865_p12 = pnand %p3864_p11, %p3858_p8 }
 0x389   :  { %v602_v30 = vadd.f32 %v3094_v26, %v2828_v61  ;;  %v726_v31 = vadd.f32 %v3114_v27, %v2837_v62  ;;  %v596_v32 = vpop.f32.mrb[7].mxu1  ;;  %v720_v33 = vpop.f32.mrb[15].mxu0 }
 0x38a   :  { %v597_v34 = vadd.f32 %v2828_v61, %v596_v32  ;;  %v721_v36 = vadd.f32 %v2837_v62, %v720_v33  ;;  %v1270_v32 = vld [vmem:[#allocation3 + $0x8] sm:$0xff] }
 0x38b   :  { %612 = vst.msk [vmem:[#allocation2 + $0x38] sm:$0xff] %vm475_vm3, %v602_v30  ;;  %736 = vst.msk [vmem:[#allocation3 + $0x38] sm:$0xff] %vm475_vm3, %v726_v31 }
 0x38c   :  { %611 = vst.msk [vmem:[#allocation2 + $0x30] sm:$0xff] %vm475_vm3, %v597_v34  ;;  %735 = vst.msk [vmem:[#allocation3 + $0x30] sm:$0xff] %vm475_vm3, %v721_v36  ;;  %v3125_v40 = vpop.f32.mrb[8].mxu1  ;;  %v949_v20 = vpop.f32.mrb[16].mxu0 }
 0x38d   :  { %v820_v42 = vadd.f32 %v3125_v40, %v2846_v37  ;;  %v1024_v43 = vadd.f32 %v1023_v41, %v949_v20  ;;  %v814_v44 = vpop.f32.mrb[9].mxu1  ;;  %v3145_v45 = vpop.f32.mrb[17].mxu0 }
 0x38e   :  { %v815_v46 = vadd.f32 %v2846_v37, %v814_v44 }
 0x38f   :  { %854 = vst.msk [vmem:[#allocation4 + $0x8] sm:$0xff] %vm475_vm3, %v820_v42  ;;  %v2856_v47 = vmul.f32 -1.442695, %v1024_v43 }
 0x390   :  { %853 = vst.msk [vmem:[#allocation4] sm:$0xff] %vm475_vm3, %v815_v46  ;;  %v3128_v50 = vpop.f32.mrb[10].mxu1 }
 0x391   :  { %3601 = vpow2.f32 %v2856_v47  ;;  %v830_v51 = vadd.f32 %v3128_v50, %v2846_v37  ;;  %v824_v28 = vpop.f32.mrb[11].mxu1 }
 0x392   :  { %v825_v21 = vadd.f32 %v2846_v37, %v824_v28 }
 0x393   :  { %856 = vst.msk [vmem:[#allocation4 + $0x18] sm:$0xff] %vm475_vm3, %v830_v51 }
 0x394   :  { %855 = vst.msk [vmem:[#allocation4 + $0x10] sm:$0xff] %vm475_vm3, %v825_v21  ;;  %v3131_v52 = vpop.f32.mrb[12].mxu1 }
 0x395   :  { %v840_v53 = vadd.f32 %v3131_v52, %v2846_v37  ;;  %v834_v54 = vpop.f32.mrb[13].mxu1  ;;  %v1106_v55 = vpop.f32.mrb[18].mxu0 }
 0x396   :  { %v835_v38 = vadd.f32 %v2846_v37, %v834_v54  ;;  %v3167_v57 = vpop.f32.mrb[19].mxu0  ;;  %v1107_v7 = vadd.f32 %v4327_v6, %v1106_v55  ;;  %v1279_v46 = vld [vmem:[#allocation4 + $0x8] sm:$0xff]  ;;  %v1501_v55 = vld [vmem:[#allocation2 + $0x10] sm:$0xff] }
 0x397   :  { %858 = vst.msk [vmem:[#allocation4 + $0x28] sm:$0xff] %vm475_vm3, %v840_v53  ;;  %v1039_v11 = vld [vmem:[#allocation4] sm:$0xff] }
 0x398   :  { %857 = vst.msk [vmem:[#allocation4 + $0x20] sm:$0xff] %vm475_vm3, %v835_v38  ;;  %v3134_v59 = vpop.f32.mrb[14].mxu1 }
 0x399   :  { %v850_v60 = vadd.f32 %v3134_v59, %v2846_v37  ;;  %v844_v61 = vpop.f32.mrb[15].mxu1 }
 0x39a   :  { %v845_v62 = vadd.f32 %v2846_v37, %v844_v61 }
 0x39b   :  { %v3602_v63 = vpop.eup %3601  ;;  %860 = vst.msk [vmem:[#allocation4 + $0x38] sm:$0xff] %vm475_vm3, %v850_v60 }
 0x39c   :  { %v1028_v0 = vadd.f32 1.0, %v3602_v63  ;;  %859 = vst.msk [vmem:[#allocation4 + $0x30] sm:$0xff] %vm475_vm3, %v845_v62  ;;  %v1019_v1 = vpop.f32.mrb[16].mxu1  ;;  %v1510_v62 = vld [vmem:[#allocation3 + $0x10] sm:$0xff] }
 0x39d   :  { %v1032_v2 = vadd.f32 %v1031_v49, %v1019_v1  ;;  %v3156_v3 = vpop.f32.mrb[17].mxu1 }
 0x39e   :  { %3603 = vrcp.f32 %v1028_v0 }
 0x39f   :  { %v2857_v5 = vmul.f32 -1.442695, %v1032_v2 }
 0x3a1   :  { %3605 = vpow2.f32 %v2857_v5 }
 0x3a8   :  { %v3604_v8 = vpop.eup %3603 }
 0x3a9   :  { %v1110_v9 = vmul.f32 %v3604_v8, %v1107_v7 }
 0x3ab   :  { %v3606_v10 = vpop.eup %3605  ;;  %v1111_v13 = vadd.f32 %v1110_v9, %v1039_v11  ;;  %v1519_v11 = vld [vmem:[#allocation4 + $0x10] sm:$0xff] }
 0x3ac   :  { %v1036_v12 = vadd.f32 1.0, %v3606_v10 }
 0x3ae   :  { %3607 = vrcp.f32 %v1036_v12 }
 0x3af   :  { %3609 = vtanh.f32 %v1111_v13 }
 0x3b8   :  { %v3608_v14 = vpop.eup %3607 }
 0x3b9   :  { %v1113_v15 = vsub.f32 1.0, %v3608_v14  ;;  %v3610_v16 = vpop.eup %3609  ;;  %v1115_v18 = vmul.f32 0.0, %v3608_v14 }
 0x3bb   :  { %v1114_v17 = vmul.f32 %v3610_v16, %v1113_v15 }
 0x3bd   :  { %v1116_v22 = vadd.f32 %v1115_v18, %v1114_v17 }
 0x3bf   :  { %3177 = vmatmul.mubr.msk.f32.vlgmr.msra.gmra.mrb[18].mxu1 %vm475_vm3, %v1116_v22  ;;  %3188 = vmatmul.mubr.msk.f32.vlgmr.msra.gmra.mrb[20].mxu0 %vm475_vm3, %v1116_v22 }
 0x3c0   :  { %3459 = vmatpush3.bf16.msra.mxu1 %v4250_v58  ;;  %3198 = vmatprep.mubr.msk.f32.mxu1 %vm3902_vm10, %v3903_v29 }
 0x3c1   :  { %3460 = vmatprep.subr.bf16.mxu1 %v3901_v4  ;;  %3465 = vmatpush3.bf16.msra.mxu0 %v4201_v19 }
 0x3c2   :  { %3466 = vmatprep.subr.bf16.mxu0 %v3901_v4  ;;  %3209 = vmatprep.mubr.msk.f32.mxu0 %vm3902_vm10, %v3903_v29 }
 0x3c4   :  { %3462 = vmatpush3.bf16.msra.mxu1 %v4261_v48 }
 0x3c5   :  { %3469 = vmatprep.subr.bf16.mxu1 %v3901_v4  ;;  %3468 = vmatpush3.bf16.msra.mxu0 %v4213_v35 }
 0x3c6   :  { %3475 = vmatprep.subr.bf16.mxu0 %v3901_v4 }
 0x3c7   :  { %3199 = vmatmul.mubr.msk.f32.vlgmr.msra.gmra.mrb[20].mxu1 %vm475_vm3, %v1116_v22 }
 0x3c8   :  { %3471 = vmatpush3.bf16.msra.mxu1 %v4242_v56  ;;  %3220 = vmatprep.mubr.msk.f32.mxu1 %vm3902_vm10, %v3903_v29 }
 0x3c9   :  { %3472 = vmatprep.subr.bf16.mxu1 %v3901_v4 }
 0x3cc   :  { %3474 = vmatpush3.bf16.msra.mxu1 %v4257_v39 }
 0x3cd   :  { %3481 = vmatprep.subr.bf16.mxu1 %v3901_v4 }
 0x492   :  { %v1186_v23 = vpop.f32.mrb[18].mxu1  ;;  %v1256_v25 = vpop.f32.mrb[20].mxu0 }
 0x493   :  { %v1262_v26 = vadd.f32 %v1261_v24, %v1186_v23  ;;  %v3178_v27 = vpop.f32.mrb[19].mxu1  ;;  %v3189_v30 = vpop.f32.mrb[21].mxu0  ;;  %v1271_v33 = vadd.f32 %v1270_v32, %v1256_v25  ;;  %v1741_v23 = vld [vmem:[#allocation2 + $0x18] sm:$0xff] }
 0x495   :  { %v2860_v31 = vmul.f32 -1.442695, %v1262_v26  ;;  %v2861_v34 = vmul.f32 -1.442695, %v1271_v33 }
 0x497   :  { %3611 = vpow2.f32 %v2860_v31  ;;  %v1750_v31 = vld [vmem:[#allocation3 + $0x18] sm:$0xff] }
 0x498   :  { %3613 = vpow2.f32 %v2861_v34 }
 0x49a   :  { %v1346_v36 = vpop.f32.mrb[20].mxu1 }
 0x49b   :  { %v3200_v37 = vpop.f32.mrb[21].mxu1  ;;  %v1347_v43 = vadd.f32 %v4327_v6, %v1346_v36 }
 0x4a1   :  { %v3612_v40 = vpop.eup %3611 }
 0x4a2   :  { %v1266_v20 = vadd.f32 1.0, %v3612_v40  ;;  %v3614_v41 = vpop.eup %3613 }
 0x4a3   :  { %v1275_v42 = vadd.f32 1.0, %v3614_v41 }
 0x4a4   :  { %3615 = vrcp.f32 %v1266_v20 }
 0x4a5   :  { %3617 = vrcp.f32 %v1275_v42 }
 0x4ae   :  { %v3616_v44 = vpop.eup %3615 }
 0x4af   :  { %v1350_v45 = vmul.f32 %v3616_v44, %v1347_v43  ;;  %v3618_v50 = vpop.eup %3617 }
 0x4b0   :  { %v1353_v51 = vsub.f32 1.0, %v3618_v50  ;;  %v1355_v52 = vmul.f32 %v3618_v50, %v1116_v22 }
 0x4b1   :  { %v1351_v47 = vadd.f32 %v1350_v45, %v1279_v46  ;;  %v1759_v45 = vld [vmem:[#allocation4 + $0x18] sm:$0xff] }
 0x4b3   :  { %3619 = vtanh.f32 %v1351_v47 }
 0x4bd   :  { %v3620_v28 = vpop.eup %3619 }
 0x4be   :  { %v1354_v21 = vmul.f32 %v3620_v28, %v1353_v51 }
 0x4c0   :  { %v1356_v53 = vadd.f32 %v1355_v52, %v1354_v21 }
 0x4c2   :  { %3210 = vmatmul.mubr.msk.f32.vlgmr.msra.gmra.mrb[22].mxu0 %vm475_vm3, %v1356_v53  ;;  %3221 = vmatmul.mubr.msk.f32.vlgmr.msra.gmra.mrb[22].mxu1 %vm475_vm3, %v1356_v53 }
 0x4c3   :  { %3477 = vmatpush3.bf16.msra.mxu0 %v4250_v58  ;;  %3231 = vmatprep.mubr.msk.f32.mxu0 %vm3902_vm10, %v3903_v29 }
 0x4c4   :  { %3478 = vmatprep.subr.bf16.mxu0 %v3901_v4  ;;  %3483 = vmatpush3.bf16.msra.mxu1 %v4201_v19 }
 0x4c5   :  { %3484 = vmatprep.subr.bf16.mxu1 %v3901_v4  ;;  %3242 = vmatprep.mubr.msk.f32.mxu1 %vm3902_vm10, %v3903_v29 }
 0x4c7   :  { %3480 = vmatpush3.bf16.msra.mxu0 %v4261_v48 }
 0x4c8   :  { %3487 = vmatprep.subr.bf16.mxu0 %v3901_v4  ;;  %3486 = vmatpush3.bf16.msra.mxu1 %v4213_v35 }
 0x4c9   :  { %3493 = vmatprep.subr.bf16.mxu1 %v3901_v4 }
 0x4ca   :  { %3232 = vmatmul.mubr.msk.f32.vlgmr.msra.gmra.mrb[24].mxu0 %vm475_vm3, %v1356_v53 }
 0x4cb   :  { %3489 = vmatpush3.bf16.msra.mxu0 %v4242_v56  ;;  %3253 = vmatprep.mubr.msk.f32.mxu0 %vm3902_vm10, %v3903_v29 }
 0x4cc   :  { %3490 = vmatprep.subr.bf16.mxu0 %v3901_v4 }
 0x4cf   :  { %3492 = vmatpush3.bf16.msra.mxu0 %v4257_v39 }
 0x4d0   :  { %3499 = vmatprep.subr.bf16.mxu0 %v3901_v4 }
 0x595   :  { %v1426_v54 = vpop.f32.mrb[22].mxu0  ;;  %v1496_v38 = vpop.f32.mrb[22].mxu1 }
 0x596   :  { %v1502_v57 = vadd.f32 %v1501_v55, %v1426_v54  ;;  %v3211_v59 = vpop.f32.mrb[23].mxu0  ;;  %v3222_v60 = vpop.f32.mrb[23].mxu1  ;;  %v1511_v63 = vadd.f32 %v1510_v62, %v1496_v38  ;;  %v1981_v54 = vld [vmem:[#allocation2 + $0x20] sm:$0xff] }
 0x598   :  { %v2865_v61 = vmul.f32 -1.442695, %v1502_v57  ;;  %v2866_v0 = vmul.f32 -1.442695, %v1511_v63 }
 0x59a   :  { %3621 = vpow2.f32 %v2865_v61  ;;  %v1990_v61 = vld [vmem:[#allocation3 + $0x20] sm:$0xff] }
 0x59b   :  { %3623 = vpow2.f32 %v2866_v0 }
 0x59d   :  { %v1586_v1 = vpop.f32.mrb[24].mxu0 }
 0x59e   :  { %v3233_v49 = vpop.f32.mrb[25].mxu0  ;;  %v1587_v8 = vadd.f32 %v4327_v6, %v1586_v1 }
 0x5a4   :  { %v3622_v2 = vpop.eup %3621 }
 0x5a5   :  { %v1506_v3 = vadd.f32 1.0, %v3622_v2  ;;  %v3624_v5 = vpop.eup %3623 }
 0x5a6   :  { %v1515_v7 = vadd.f32 1.0, %v3624_v5 }
 0x5a7   :  { %3625 = vrcp.f32 %v1506_v3 }
 0x5a8   :  { %3627 = vrcp.f32 %v1515_v7 }
 0x5b1   :  { %v3626_v9 = vpop.eup %3625 }
 0x5b2   :  { %v1590_v10 = vmul.f32 %v3626_v9, %v1587_v8  ;;  %v3628_v13 = vpop.eup %3627 }
 0x5b3   :  { %v1593_v14 = vsub.f32 1.0, %v3628_v13  ;;  %v1595_v17 = vmul.f32 %v3628_v13, %v1356_v53 }
 0x5b4   :  { %v1591_v12 = vadd.f32 %v1590_v10, %v1519_v11  ;;  %v1999_v10 = vld [vmem:[#allocation4 + $0x20] sm:$0xff] }
 0x5b6   :  { %3629 = vtanh.f32 %v1591_v12 }
 0x5c0   :  { %v3630_v15 = vpop.eup %3629 }
 0x5c1   :  { %v1594_v16 = vmul.f32 %v3630_v15, %v1593_v14 }
 0x5c3   :  { %v1596_v18 = vadd.f32 %v1595_v17, %v1594_v16 }
 0x5c5   :  { %3243 = vmatmul.mubr.msk.f32.vlgmr.msra.gmra.mrb[24].mxu1 %vm475_vm3, %v1596_v18  ;;  %3254 = vmatmul.mubr.msk.f32.vlgmr.msra.gmra.mrb[26].mxu0 %vm475_vm3, %v1596_v18 }
 0x5c6   :  { %3495 = vmatpush3.bf16.msra.mxu1 %v4250_v58  ;;  %3264 = vmatprep.mubr.msk.f32.mxu1 %vm3902_vm10, %v3903_v29 }
 0x5c7   :  { %3496 = vmatprep.subr.bf16.mxu1 %v3901_v4  ;;  %3501 = vmatpush3.bf16.msra.mxu0 %v4201_v19 }
 0x5c8   :  { %3502 = vmatprep.subr.bf16.mxu0 %v3901_v4  ;;  %3275 = vmatprep.mubr.msk.f32.mxu0 %vm3902_vm10, %v3903_v29 }
 0x5ca   :  { %3498 = vmatpush3.bf16.msra.mxu1 %v4261_v48 }
 0x5cb   :  { %3505 = vmatprep.subr.bf16.mxu1 %v3901_v4  ;;  %3504 = vmatpush3.bf16.msra.mxu0 %v4213_v35 }
 0x5cc   :  { %3511 = vmatprep.subr.bf16.mxu0 %v3901_v4 }
 0x5cd   :  { %3265 = vmatmul.mubr.msk.f32.vlgmr.msra.gmra.mrb[26].mxu1 %vm475_vm3, %v1596_v18 }
 0x5ce   :  { %3507 = vmatpush3.bf16.msra.mxu1 %v4242_v56  ;;  %3286 = vmatprep.mubr.msk.f32.mxu1 %vm3902_vm10, %v3903_v29 }
 0x5cf   :  { %3508 = vmatprep.subr.bf16.mxu1 %v3901_v4 }
 0x5d2   :  { %3510 = vmatpush3.bf16.msra.mxu1 %v4257_v39 }
 0x5d3   :  { %3517 = vmatprep.subr.bf16.mxu1 %v3901_v4 }
 0x698   :  { %v1666_v22 = vpop.f32.mrb[24].mxu1  ;;  %v1736_v24 = vpop.f32.mrb[26].mxu0 }
 0x699   :  { %v1742_v25 = vadd.f32 %v1741_v23, %v1666_v22  ;;  %v3244_v26 = vpop.f32.mrb[25].mxu1  ;;  %v3255_v27 = vpop.f32.mrb[27].mxu0  ;;  %v1751_v32 = vadd.f32 %v1750_v31, %v1736_v24  ;;  %v2221_v22 = vld [vmem:[#allocation2 + $0x28] sm:$0xff] }
 0x69b   :  { %v2870_v30 = vmul.f32 -1.442695, %v1742_v25  ;;  %v2871_v33 = vmul.f32 -1.442695, %v1751_v32 }
 0x69d   :  { %3631 = vpow2.f32 %v2870_v30  ;;  %v2230_v30 = vld [vmem:[#allocation3 + $0x28] sm:$0xff] }
 0x69e   :  { %3633 = vpow2.f32 %v2871_v33 }
 0x6a0   :  { %v1826_v34 = vpop.f32.mrb[26].mxu1 }
 0x6a1   :  { %v3266_v36 = vpop.f32.mrb[27].mxu1  ;;  %v1827_v42 = vadd.f32 %v4327_v6, %v1826_v34 }
 0x6a7   :  { %v3632_v37 = vpop.eup %3631 }
 0x6a8   :  { %v1746_v40 = vadd.f32 1.0, %v3632_v37  ;;  %v3634_v20 = vpop.eup %3633 }
 0x6a9   :  { %v1755_v41 = vadd.f32 1.0, %v3634_v20 }
 0x6aa   :  { %3635 = vrcp.f32 %v1746_v40 }
 0x6ab   :  { %3637 = vrcp.f32 %v1755_v41 }
 0x6b4   :  { %v3636_v43 = vpop.eup %3635 }
 0x6b5   :  { %v1830_v44 = vmul.f32 %v3636_v43, %v1827_v42  ;;  %v3638_v47 = vpop.eup %3637 }
 0x6b6   :  { %v1833_v50 = vsub.f32 1.0, %v3638_v47  ;;  %v1835_v21 = vmul.f32 %v3638_v47, %v1596_v18 }
 0x6b7   :  { %v1831_v46 = vadd.f32 %v1830_v44, %v1759_v45  ;;  %v2239_v44 = vld [vmem:[#allocation4 + $0x28] sm:$0xff] }
 0x6b9   :  { %3639 = vtanh.f32 %v1831_v46 }
 0x6c3   :  { %v3640_v51 = vpop.eup %3639 }
 0x6c4   :  { %v1834_v28 = vmul.f32 %v3640_v51, %v1833_v50 }
 0x6c6   :  { %v1836_v52 = vadd.f32 %v1835_v21, %v1834_v28 }
 0x6c8   :  { %3276 = vmatmul.mubr.msk.f32.vlgmr.msra.gmra.mrb[28].mxu0 %vm475_vm3, %v1836_v52  ;;  %3287 = vmatmul.mubr.msk.f32.vlgmr.msra.gmra.mrb[28].mxu1 %vm475_vm3, %v1836_v52 }
 0x6c9   :  { %3513 = vmatpush3.bf16.msra.mxu0 %v4250_v58  ;;  %3297 = vmatprep.mubr.msk.f32.mxu0 %vm3902_vm10, %v3903_v29 }
 0x6ca   :  { %3514 = vmatprep.subr.bf16.mxu0 %v3901_v4  ;;  %3519 = vmatpush3.bf16.msra.mxu1 %v4201_v19 }
 0x6cb   :  { %3520 = vmatprep.subr.bf16.mxu1 %v3901_v4  ;;  %3308 = vmatprep.mubr.msk.f32.mxu1 %vm3902_vm10, %v3903_v29 }
 0x6cd   :  { %3516 = vmatpush3.bf16.msra.mxu0 %v4261_v48 }
 0x6ce   :  { %3523 = vmatprep.subr.bf16.mxu0 %v3901_v4  ;;  %3522 = vmatpush3.bf16.msra.mxu1 %v4213_v35 }
 0x6cf   :  { %3529 = vmatprep.subr.bf16.mxu1 %v3901_v4 }
 0x6d0   :  { %3298 = vmatmul.mubr.msk.f32.vlgmr.msra.gmra.mrb[30].mxu0 %vm475_vm3, %v1836_v52 }
 0x6d1   :  { %3525 = vmatpush3.bf16.msra.mxu0 %v4242_v56  ;;  %3319 = vmatprep.mubr.msk.f32.mxu0 %vm3902_vm10, %v3903_v29 }
 0x6d2   :  { %3526 = vmatprep.subr.bf16.mxu0 %v3901_v4 }
 0x6d5   :  { %3528 = vmatpush3.bf16.msra.mxu0 %v4257_v39 }
 0x6d6   :  { %3535 = vmatprep.subr.bf16.mxu0 %v3901_v4 }
 0x79b   :  { %v1906_v53 = vpop.f32.mrb[28].mxu0  ;;  %v1976_v55 = vpop.f32.mrb[28].mxu1 }
 0x79c   :  { %v1982_v38 = vadd.f32 %v1981_v54, %v1906_v53  ;;  %v3277_v57 = vpop.f32.mrb[29].mxu0  ;;  %v3288_v59 = vpop.f32.mrb[29].mxu1  ;;  %v1991_v62 = vadd.f32 %v1990_v61, %v1976_v55 }
 0x79d   :  { %v2470_v57 = vld [vmem:[#allocation3 + $0x30] sm:$0xff] }
 0x79e   :  { %v2875_v60 = vmul.f32 -1.442695, %v1982_v38  ;;  %v2876_v63 = vmul.f32 -1.442695, %v1991_v62 }
 0x7a0   :  { %3641 = vpow2.f32 %v2875_v60 }
 0x7a1   :  { %3643 = vpow2.f32 %v2876_v63 }
 0x7a3   :  { %v2066_v0 = vpop.f32.mrb[30].mxu0 }
 0x7a4   :  { %v3299_v1 = vpop.f32.mrb[31].mxu0  ;;  %v2067_v7 = vadd.f32 %v4327_v6, %v2066_v0 }
 0x7aa   :  { %v3642_v49 = vpop.eup %3641 }
 0x7ab   :  { %v1986_v2 = vadd.f32 1.0, %v3642_v49  ;;  %v3644_v3 = vpop.eup %3643 }
 0x7ac   :  { %v1995_v5 = vadd.f32 1.0, %v3644_v3  ;;  %v2479_v3 = vld [vmem:[#allocation4 + $0x30] sm:$0xff] }
 0x7ad   :  { %3645 = vrcp.f32 %v1986_v2 }
 0x7ae   :  { %3647 = vrcp.f32 %v1995_v5 }
 0x7b7   :  { %v3646_v8 = vpop.eup %3645 }
 0x7b8   :  { %v2070_v9 = vmul.f32 %v3646_v8, %v2067_v7  ;;  %v3648_v12 = vpop.eup %3647 }
 0x7b9   :  { %v2073_v13 = vsub.f32 1.0, %v3648_v12  ;;  %v2075_v16 = vmul.f32 %v3648_v12, %v1836_v52  ;;  %v2461_v52 = vld [vmem:[#allocation2 + $0x30] sm:$0xff] }
 0x7ba   :  { %v2071_v11 = vadd.f32 %v2070_v9, %v1999_v10 }
 0x7bc   :  { %3649 = vtanh.f32 %v2071_v11 }
 0x7c6   :  { %v3650_v14 = vpop.eup %3649 }
 0x7c7   :  { %v2074_v15 = vmul.f32 %v3650_v14, %v2073_v13  ;;  %v2701_v14 = vld [vmem:[#allocation2 + $0x38] sm:$0xff] }
 0x7c9   :  { %v2076_v17 = vadd.f32 %v2075_v16, %v2074_v15 }
 0x7cb   :  { %3309 = vmatmul.mubr.msk.f32.vlgmr.msra.gmra.mrb[30].mxu1 %vm475_vm3, %v2076_v17  ;;  %3320 = vmatmul.mubr.msk.f32.vlgmr.msra.gmra.mrb[32].mxu0 %vm475_vm3, %v2076_v17 }
 0x7cc   :  { %3531 = vmatpush3.bf16.msra.mxu1 %v4250_v58  ;;  %3330 = vmatprep.mubr.msk.f32.mxu1 %vm3902_vm10, %v3903_v29 }
 0x7cd   :  { %3532 = vmatprep.subr.bf16.mxu1 %v3901_v4  ;;  %3537 = vmatpush3.bf16.msra.mxu0 %v4201_v19 }
 0x7ce   :  { %3538 = vmatprep.subr.bf16.mxu0 %v3901_v4  ;;  %3341 = vmatprep.mubr.msk.f32.mxu0 %vm3902_vm10, %v3903_v29 }
 0x7d0   :  { %3534 = vmatpush3.bf16.msra.mxu1 %v4261_v48 }
 0x7d1   :  { %3541 = vmatprep.subr.bf16.mxu1 %v3901_v4  ;;  %3540 = vmatpush3.bf16.msra.mxu0 %v4213_v35 }
 0x7d2   :  { %3547 = vmatprep.subr.bf16.mxu0 %v3901_v4 }
 0x7d3   :  { %3331 = vmatmul.mubr.msk.f32.vlgmr.msra.gmra.mrb[32].mxu1 %vm475_vm3, %v2076_v17 }
 0x7d4   :  { %3543 = vmatpush3.bf16.msra.mxu1 %v4242_v56  ;;  %3352 = vmatprep.mubr.msk.f32.mxu1 %vm3902_vm10, %v3903_v29 }
 0x7d5   :  { %3544 = vmatprep.subr.bf16.mxu1 %v3901_v4 }
 0x7d8   :  { %3546 = vmatpush3.bf16.msra.mxu1 %v4257_v39 }
 0x7d9   :  { %3553 = vmatprep.subr.bf16.mxu1 %v3901_v4 }
 0x89e   :  { %v2146_v18 = vpop.f32.mrb[30].mxu1  ;;  %v2216_v23 = vpop.f32.mrb[32].mxu0 }
 0x89f   :  { %v2222_v24 = vadd.f32 %v2221_v22, %v2146_v18  ;;  %v3310_v25 = vpop.f32.mrb[31].mxu1  ;;  %v3321_v26 = vpop.f32.mrb[33].mxu0  ;;  %v2231_v31 = vadd.f32 %v2230_v30, %v2216_v23  ;;  %v2710_v23 = vld [vmem:[#allocation3 + $0x38] sm:$0xff] }
 0x8a1   :  { %v2880_v27 = vmul.f32 -1.442695, %v2222_v24  ;;  %v2881_v32 = vmul.f32 -1.442695, %v2231_v31 }
 0x8a3   :  { %3651 = vpow2.f32 %v2880_v27 }
 0x8a4   :  { %3653 = vpow2.f32 %v2881_v32 }
 0x8a6   :  { %v2306_v33 = vpop.f32.mrb[32].mxu1 }
 0x8a7   :  { %v3332_v34 = vpop.f32.mrb[33].mxu1  ;;  %v2307_v41 = vadd.f32 %v4327_v6, %v2306_v33  ;;  %v2719_v33 = vld [vmem:[#allocation4 + $0x38] sm:$0xff] }
 0x8ad   :  { %v3652_v36 = vpop.eup %3651 }
 0x8ae   :  { %v2226_v37 = vadd.f32 1.0, %v3652_v36  ;;  %v3654_v40 = vpop.eup %3653 }
 0x8af   :  { %v2235_v20 = vadd.f32 1.0, %v3654_v40 }
 0x8b0   :  { %3655 = vrcp.f32 %v2226_v37 }
 0x8b1   :  { %3657 = vrcp.f32 %v2235_v20 }
 0x8ba   :  { %v3656_v42 = vpop.eup %3655 }
 0x8bb   :  { %v2310_v43 = vmul.f32 %v3656_v42, %v2307_v41  ;;  %v3658_v46 = vpop.eup %3657 }
 0x8bc   :  { %v2313_v47 = vsub.f32 1.0, %v3658_v46  ;;  %v2315_v28 = vmul.f32 %v3658_v46, %v2076_v17 }
 0x8bd   :  { %v2311_v45 = vadd.f32 %v2310_v43, %v2239_v44 }
 0x8bf   :  { %3659 = vtanh.f32 %v2311_v45 }
 0x8c9   :  { %v3660_v50 = vpop.eup %3659 }
 0x8ca   :  { %v2314_v51 = vmul.f32 %v3660_v50, %v2313_v47 }
 0x8cc   :  { %v2316_v21 = vadd.f32 %v2315_v28, %v2314_v51 }
 0x8ce   :  { %3342 = vmatmul.mubr.msk.f32.vlgmr.msra.gmra.mrb[34].mxu0 %vm475_vm3, %v2316_v21  ;;  %3353 = vmatmul.mubr.msk.f32.vlgmr.msra.gmra.mrb[34].mxu1 %vm475_vm3, %v2316_v21 }
 0x8cf   :  { %3549 = vmatpush3.bf16.msra.mxu0 %v4250_v58  ;;  %3363 = vmatprep.mubr.msk.f32.mxu0 %vm3902_vm10, %v3903_v29 }
 0x8d0   :  { %3550 = vmatprep.subr.bf16.mxu0 %v3901_v4  ;;  %3555 = vmatpush3.bf16.msra.mxu1 %v4201_v19 }
 0x8d1   :  { %3556 = vmatprep.subr.bf16.mxu1 %v3901_v4  ;;  %3374 = vmatprep.mubr.msk.f32.mxu1 %vm3902_vm10, %v3903_v29 }
 0x8d3   :  { %3552 = vmatpush3.bf16.msra.mxu0 %v4261_v48 }
 0x8d4   :  { %3559 = vmatprep.subr.bf16.mxu0 %v3901_v4  ;;  %3558 = vmatpush3.bf16.msra.mxu1 %v4213_v35 }
 0x8d5   :  { %3565 = vmatprep.subr.bf16.mxu1 %v3901_v4 }
 0x8d6   :  { %3364 = vmatmul.mubr.msk.f32.vlgmr.msra.gmra.mrb[36].mxu0 %vm475_vm3, %v2316_v21 }
 0x8d7   :  { %3561 = vmatpush3.bf16.msra.mxu0 %v4242_v56  ;;  %3385 = vmatprep.mubr.msk.f32.mxu0 %vm3902_vm10, %v3903_v29 }
 0x8d8   :  { %3562 = vmatprep.subr.bf16.mxu0 %v3901_v4 }
 0x8db   :  { %3564 = vmatpush3.bf16.msra.mxu0 %v4257_v39 }
 0x9a1   :  { %v2386_v19 = vpop.f32.mrb[34].mxu0  ;;  %v2456_v53 = vpop.f32.mrb[34].mxu1 }
 0x9a2   :  { %v2462_v54 = vadd.f32 %v2461_v52, %v2386_v19  ;;  %v3343_v55 = vpop.f32.mrb[35].mxu0  ;;  %v3354_v38 = vpop.f32.mrb[35].mxu1  ;;  %v2471_v59 = vadd.f32 %v2470_v57, %v2456_v53 }
 0x9a4   :  { %v2885_v35 = vmul.f32 -1.442695, %v2462_v54  ;;  %v2886_v60 = vmul.f32 -1.442695, %v2471_v59 }
 0x9a6   :  { %3661 = vpow2.f32 %v2885_v35 }
 0x9a7   :  { %3663 = vpow2.f32 %v2886_v60 }
 0x9a9   :  { %v2546_v61 = vpop.f32.mrb[36].mxu0 }
 0x9aa   :  { %v3365_v56 = vpop.f32.mrb[37].mxu0  ;;  %v2547_v39 = vadd.f32 %v4327_v6, %v2546_v61 }
 0x9b0   :  { %v3662_v62 = vpop.eup %3661 }
 0x9b1   :  { %v2466_v63 = vadd.f32 1.0, %v3662_v62  ;;  %v3664_v0 = vpop.eup %3663 }
 0x9b2   :  { %v2475_v1 = vadd.f32 1.0, %v3664_v0 }
 0x9b3   :  { %3665 = vrcp.f32 %v2466_v63 }
 0x9b4   :  { %3667 = vrcp.f32 %v2475_v1 }
 0x9bd   :  { %v3666_v49 = vpop.eup %3665 }
 0x9be   :  { %v2550_v2 = vmul.f32 %v3666_v49, %v2547_v39  ;;  %v3668_v7 = vpop.eup %3667 }
 0x9bf   :  { %v2553_v8 = vsub.f32 1.0, %v3668_v7  ;;  %v2555_v11 = vmul.f32 %v3668_v7, %v2316_v21 }
 0x9c0   :  { %v2551_v5 = vadd.f32 %v2550_v2, %v2479_v3 }
 0x9c2   :  { %3669 = vtanh.f32 %v2551_v5 }
 0x9cc   :  { %v3670_v9 = vpop.eup %3669 }
 0x9cd   :  { %v2554_v10 = vmul.f32 %v3670_v9, %v2553_v8 }
 0x9cf   :  { %v2556_v12 = vadd.f32 %v2555_v11, %v2554_v10 }
 0x9d1   :  { %3375 = vmatmul.mubr.msk.f32.vlgmr.msra.gmra.mrb[36].mxu1 %vm475_vm3, %v2556_v12  ;;  %3386 = vmatmul.mubr.msk.f32.vlgmr.msra.gmra.mrb[38].mxu0 %vm475_vm3, %v2556_v12 }
 0x9d2   :  { %3567 = vmatpush3.bf16.msra.mxu1 %v4250_v58  ;;  %3396 = vmatprep.mubr.msk.f32.mxu1 %vm3902_vm10, %v3903_v29 }
 0x9d3   :  { %3568 = vmatprep.subr.bf16.mxu1 %v3901_v4 }
 0x9d6   :  { %3570 = vmatpush3.bf16.msra.mxu1 %v4261_v48 }
 0x9d9   :  { %3397 = vmatmul.mubr.msk.f32.vlgmr.msra.gmra.mrb[38].mxu1 %vm475_vm3, %v2556_v12 }
 0xaa4   :  { %v2626_v13 = vpop.f32.mrb[36].mxu1  ;;  %v2696_v15 = vpop.f32.mrb[38].mxu0 }
 0xaa5   :  { %v2702_v16 = vadd.f32 %v2701_v14, %v2626_v13  ;;  %v3376_v17 = vpop.f32.mrb[37].mxu1  ;;  %v3387_v18 = vpop.f32.mrb[39].mxu0  ;;  %v2711_v24 = vadd.f32 %v2710_v23, %v2696_v15 }
 0xaa7   :  { %v2890_v22 = vmul.f32 -1.442695, %v2702_v16  ;;  %v2891_v58 = vmul.f32 -1.442695, %v2711_v24 }
 0xaa9   :  { %3671 = vpow2.f32 %v2890_v22 }
 0xaaa   :  { %3673 = vpow2.f32 %v2891_v58 }
 0xaac   :  { %v2786_v25 = vpop.f32.mrb[38].mxu1 }
 0xaad   :  { %v3398_v26 = vpop.f32.mrb[39].mxu1  ;;  %v2787_v30 = vadd.f32 %v4327_v6, %v2786_v25 }
 0xab3   :  { %v3672_v29 = vpop.eup %3671 }
 0xab4   :  { %v2706_v4 = vadd.f32 1.0, %v3672_v29  ;;  %v3674_v48 = vpop.eup %3673 }
 0xab5   :  { %v2715_v27 = vadd.f32 1.0, %v3674_v48 }
 0xab6   :  { %3675 = vrcp.f32 %v2706_v4 }
 0xab7   :  { %3677 = vrcp.f32 %v2715_v27 }
 0xac0   :  { %v3676_v31 = vpop.eup %3675 }
 0xac1   :  { %v2790_v32 = vmul.f32 %v3676_v31, %v2787_v30  ;;  %v3678_v36 = vpop.eup %3677 }
 0xac2   :  { %v2793_v37 = vsub.f32 1.0, %v3678_v36  ;;  %v2795_v41 = vmul.f32 %v3678_v36, %v2556_v12 }
 0xac3   :  { %v2791_v34 = vadd.f32 %v2790_v32, %v2719_v33 }
 0xac5   :  { %3679 = vtanh.f32 %v2791_v34 }
 0xacf   :  { %v3680_v40 = vpop.eup %3679 }
 0xad0   :  { %v2794_v20 = vmul.f32 %v3680_v40, %v2793_v37 }
 0xad2   :  { %v2796_v42 = vadd.f32 %v2795_v41, %v2794_v20 }
 0xad4   :  { %2797 = vst.msk [vmem:[#allocation19] sm:$0xff] %vm475_vm3, %v2796_v42 }
 0xad5   :  { %3868 = shalt.err (!%p3865_p12)
}
 0xad6   :  { %s3869_s22 = scalar_lea.hbm %s4498_s15, 128 }
 0xad7   :  { %p3870_p13 = scmp.ne.s32.totalorder %s4498_s15, %s3869_s22  ;;  %p3873_p0 = scmp.lt.u32.totalorder %s3869_s22, %s4498_s15 }
 0xad9   :  { %p3875_p1 = pnand %p3873_p0, %p3870_p13 }
 0xadb   :  { %3878 = shalt.err (!%p3875_p1)
}
 0xadc   :  { %2807 = dma.vmem_to_hbm [thread:$0]  %s2805_s29, 128, %s4498_s15, [#allocation7]  }
 0xadd   :  { %3889 = dma.done.wait [#allocation7], 128  }
 0xade   :  { %3890 = vsyncadd [#allocation7], 4294967168 }
 0xadf   :  { %2811 = vsyncpa [#allocation6], 1 }
 0xae0   :  { %2812 = vsyncpa [#allocation9], 1 }
 0xae1   :  { %2813 = vsyncpa [#allocation12], 1 }
 0xae2   :  { %2814 = vsyncpa [#allocation15], 1 }
 0xae3   :  { %2815 = vsyncpa [#allocation18], 1 }
 0xae4   :  { %2816 = vsyncpa [#allocation7], 1 }

</bundles_post_ra>
